<compile_context>
chip_gen: v7x
topology: tpu7x:2x2x1
jax: 0.10.0
libtpu: 0.0.40
codegen_flags: <defaults>
</compile_context>

<pallas_src>
import functools

import jax
import jax.numpy as jnp
from jax import lax
from jax.experimental import pallas as pl
from jax.experimental.pallas import tpu as pltpu


def _exp_in_bf16_for_backend():
    """bf16 exp only on chips with a bf16-capable VPU/EUP (v6e / v7x)."""
    try:
        kind = jax.devices()[0].device_kind.lower()
    except Exception:
        kind = ""
    return ("v6" in kind) or ("v7" in kind) or ("7x" in kind)


def _make_dpam_kernel(chans, cmax, B, N, *, exp_in_bf16, bn_eps=1e-5):
    L = len(chans) - 1
    K = chans[-1]
    inv_cnt = 1.0 / float(B * N)

    def kernel(x_ref, params_ref, xout_ref, aux_ref):
        x = x_ref[...].astype(jnp.float32)                        # (B, C0, N)
        params = params_ref[...]                                  # (L, cmax, cmax+2)

        # ---- finiteness flag, computed on the block already in VMEM ----
        # TODO(synk): torch raises eagerly on non-finite input; inside a jitted
        # Pallas program we can only export a flag for the caller to check.
        finmask = jnp.isfinite(x).astype(jnp.float32)
        f_all = jnp.min(jnp.min(jnp.min(finmask, axis=2, keepdims=True),
                                axis=1, keepdims=True),
                        axis=0, keepdims=True)                    # (1, 1, 1)
        fin_row = jnp.broadcast_to(f_all.reshape(1, 1), (1, 128))

        # ---- attention: A = softmax(dim=2) of x^T x; normalization deferred ----
        xb16 = x.astype(jnp.bfloat16)
        # NOTE: contraction is on the sublane dim of both operands; any relayout
        # Mosaic inserts is on a (<=8, 256) tile and accepted as tiny.
        gram = jnp.einsum('bci,bcj->bij', xb16, xb16,
                          preferred_element_type=jnp.float32)     # (B, N, N)
        gmax = jnp.max(gram, axis=1, keepdims=True)               # (B, 1, N)
        if exp_in_bf16:
            # v6e/v7x: bf16 EUP -> exp directly in bf16, f32 column-sum accum.
            gexp = jnp.exp((gram - gmax).astype(jnp.bfloat16))    # (B,N,N) bf16
            colsum = jnp.sum(gexp, axis=1, keepdims=True,
                             dtype=jnp.float32)                   # (B, 1, N)
        else:
            # v5e/older: no bf16 VPU/EUP -> keep elementwise math in f32.
            gexp_f32 = jnp.exp(gram - gmax)
            colsum = jnp.sum(gexp_f32, axis=1, keepdims=True)
            gexp = gexp_f32.astype(jnp.bfloat16)                  # MXU operand
        inv_s = pl.reciprocal(colsum, approx=True)                # (B, 1, N)

        # ---- layer loop on a lane-merged (C, B*N) activation slab ----
        xw = None                                                 # (c, B*N) f32
        for i in range(L):
            c_in, c_out = chans[i], chans[i + 1]

            if i < L - 2:
                # x <- x @ A per batch; the column normalization is applied
                # after the matmul (bf16 operands, f32 MXU accumulation).
                parts = []
                for b in range(B):
                    src = x[b] if xw is None else xw[:, b * N:(b + 1) * N]
                    xm = jnp.dot(src.astype(jnp.bfloat16), gexp[b],
                                 preferred_element_type=jnp.float32)
                    parts.append(xm * inv_s[b])                   # (c_in, N)
                xw = jnp.concatenate(parts, axis=1)               # (c_in, B*N)
            elif xw is None:
                xw = jnp.concatenate([x[b] for b in range(B)], axis=1)

            w_i   = params[i, 0:c_out, 0:c_in]                    # (c_out, c_in)
            gamma = params[i, 0:c_out, cmax:cmax + 1]             # (c_out, 1)
            beta  = params[i, 0:c_out, cmax + 1:cmax + 2]         # (c_out, 1)

            # 1x1 conv (no bias) == channel-mixing matmul over the whole B*N
            # lane slab -- one wide f32 dot instead of per-batch dots + stack.
            y = jnp.dot(w_i, xw, preferred_element_type=jnp.float32)

            # BatchNorm2d (training mode): per-channel batch stats over B*N
            # lanes in a single sum / sum-of-squares pass, biased variance,
            # affine folded into one scale/shift per channel.
            # TODO(synk): running_mean/running_var buffer updates (momentum)
            # are not modelled; they do not affect the training-mode output.
            s1 = jnp.sum(y, axis=1, keepdims=True)                # (c_out, 1)
            s2 = jnp.sum(y * y, axis=1, keepdims=True)
            mu = s1 * inv_cnt
            var = s2 * inv_cnt - mu * mu
            scale = gamma * lax.rsqrt(var + bn_eps)
            shift = beta - mu * scale
            xw = jnp.maximum(y * scale + shift, 0.0)              # BN + ReLU

        # ---- softmax over N (torch dim=3) per batch + Frobenius-norm aux ----
        eye = (lax.broadcasted_iota(jnp.int32, (K, K), 0)
               == lax.broadcasted_iota(jnp.int32, (K, K), 1)).astype(jnp.float32)
        lane = lax.broadcasted_iota(jnp.int32, (1, 128), 1)
        for b in range(B):
            xb = xw[:, b * N:(b + 1) * N]                         # (K, N)
            m = jnp.max(xb, axis=1, keepdims=True)
            e = jnp.exp(xb - m)
            p = e * pl.reciprocal(jnp.sum(e, axis=1, keepdims=True),
                                  approx=True)
            xout_ref[b] = p.astype(xout_ref.dtype)

            # l[b] = || I_K - p p^T ||_F  (tiny f32 matmul for better parity)
            P = jnp.einsum('kn,jn->kj', p, p,
                           preferred_element_type=jnp.float32)    # (K, K)
            D = eye - P
            sq = jnp.sum(jnp.sum(D * D, axis=1, keepdims=True),
                         axis=0, keepdims=True)                   # (1, 1)
            l_row = jnp.broadcast_to(jnp.sqrt(sq), (1, 128))
            # lane 0 -> l[b], lane 1 -> finiteness flag, rest is padding.
            aux_ref[b:b + 1, :] = jnp.where(lane == 1, fin_row, l_row)

    return kernel


def pack_dpam_params(weights, gammas, betas):
    """One-time packing of all layer params into a single small VMEM operand.

    Call when the parameters change, NOT per forward pass (the ~12 tiny
    update-slice HLOs it emits would otherwise dominate the dispatch-bound
    forward call).  Layout per layer i:
      params[i, :c_out, :c_in]  = conv weight
      params[i, :c_out, cmax]   = bn gamma
      params[i, :c_out, cmax+1] = bn beta
    """
    chans = [int(weights[0].shape[1])] + [int(w.shape[0]) for w in weights]
    cmax = max(chans)
    rows = []
    for w, g, b in zip(weights, gammas, betas):
        co, ci = w.shape
        p = jnp.zeros((cmax, cmax + 2), jnp.float32)
        p = p.at[:co, :ci].set(jnp.asarray(w, jnp.float32))
        p = p.at[:co, cmax].set(jnp.asarray(g, jnp.float32).reshape(-1))
        p = p.at[:co, cmax + 1].set(jnp.asarray(b, jnp.float32).reshape(-1))
        rows.append(p)
    return jnp.stack(rows, axis=0), tuple(chans)


@functools.partial(jax.jit, static_argnames=("chans",))
def dpam_forward(x_nchw, params, *, chans):
    B, C0, H, W = x_nchw.shape
    N = H * W
    L = len(chans) - 1
    K = chans[-1]
    cmax = max(chans)
    assert chans[0] == C0

    x = x_nchw.reshape(B, C0, N).astype(jnp.float32)

    # Advisory cost hint for XLA's scheduler around the tiny custom call.
    flops = 2 * B * C0 * N * N + 2 * B * K * K * N
    for i in range(L):
        c_in, c_out = chans[i], chans[i + 1]
        if i < L - 2:
            flops += 2 * B * c_in * N * N
        flops += 2 * c_out * c_in * B * N
    transcendentals = B * N * N + B * K * N
    bytes_accessed = 4 * (B * C0 * N + L * cmax * (cmax + 2)
                          + B * K * N + B * 128)

    exp_in_bf16 = _exp_in_bf16_for_backend()

    xout, aux = pl.pallas_call(
        _make_dpam_kernel(chans, cmax, B, N, exp_in_bf16=exp_in_bf16),
        out_shape=(jax.ShapeDtypeStruct((B, K, N), jnp.float32),
                   jax.ShapeDtypeStruct((B, 128), jnp.float32)),
        in_specs=[pl.BlockSpec(memory_space=pltpu.MemorySpace.VMEM),
                  pl.BlockSpec(memory_space=pltpu.MemorySpace.VMEM)],
        out_specs=(pl.BlockSpec(memory_space=pltpu.MemorySpace.VMEM),
                   pl.BlockSpec(memory_space=pltpu.MemorySpace.VMEM)),
        cost_estimate=pl.CostEstimate(flops=flops,
                                      transcendentals=transcendentals,
                                      bytes_accessed=bytes_accessed),
    )(x, params)

    # Restore torch output shapes: x -> (B, 1, K, N), l -> (B,).  The finite
    # flag is returned for LAZY checking (no host round trip in the hot path).
    l = aux[:, 0]
    finite = aux[0, 1] > 0.0
    return xout.reshape(B, 1, K, N), l, finite


if __name__ == "__main__":
    planes_tab = [4, 8, 8, 4]
    B, H, W = 2, 16, 16

    key = jax.random.PRNGKey(0)
    keys = jax.random.split(key, 1 + (len(planes_tab) - 1))
    kx, kws = keys[0], keys[1:]

    x = jax.random.normal(kx, (B, planes_tab[0], H, W), dtype=jnp.float32)

    weights, gammas, betas = [], [], []
    for i in range(len(planes_tab) - 1):
        cin, cout = planes_tab[i], planes_tab[i + 1]
        # kaiming_normal_(mode='fan_out', nonlinearity='relu'): std = sqrt(2/fan_out)
        std = (2.0 / cout) ** 0.5
        weights.append(std * jax.random.normal(kws[i], (cout, cin), dtype=jnp.float32))
        gammas.append(jnp.ones((cout,), dtype=jnp.float32))   # BN weight = 1
        betas.append(jnp.zeros((cout,), dtype=jnp.float32))   # BN bias = 0

    # One-time parameter packing (hoisted out of the per-call hot path).
    params, chans = pack_dpam_params(weights, gammas, betas)
    params = jax.block_until_ready(params)

    xout, l, finite = dpam_forward(x, params, chans=chans)
    jax.block_until_ready((xout, l, finite))

    if not bool(finite):   # lazy check; results are already materialized here
        raise Exception('NaN or inf in x')

    K, N = planes_tab[-1], H * W
    assert xout.shape == (B, 1, K, N)
    assert l.shape == (B,)
    assert bool(jnp.all(jnp.isfinite(xout))) and bool(jnp.all(jnp.isfinite(l)))
    print("KERNEL_OK")
</pallas_src>

<mosaic_0001>
module attributes {stable_mosaic.version = 11 : i64} {
  func.func @kernel(%arg0: memref<2x4x256xf32, #tpu.memory_space<vmem>>, %arg1: memref<3x8x10xf32, #tpu.memory_space<vmem>>, %arg2: memref<2x4x256xf32, #tpu.memory_space<vmem>>, %arg3: memref<2x128xf32, #tpu.memory_space<vmem>>) attributes {dimension_semantics = [], scalar_prefetch = 0 : i64, scratch_operands = 0 : i64, tpu.core_type = #tpu.core_type<tc>} {
    %c0 = arith.constant 0 : index
    %c0_0 = arith.constant 0 : index
    %c0_1 = arith.constant 0 : index
    %0 = vector.load %arg0[%c0, %c0_0, %c0_1] : memref<2x4x256xf32, #tpu.memory_space<vmem>>, vector<2x4x256xf32>
    %c0_2 = arith.constant 0 : index
    %c0_3 = arith.constant 0 : index
    %c0_4 = arith.constant 0 : index
    %1 = vector.load %arg1[%c0_2, %c0_3, %c0_4] : memref<3x8x10xf32, #tpu.memory_space<vmem>>, vector<3x8x10xf32>
    %2 = tpu.weird %0 : vector<2x4x256xf32> -> vector<2x4x256xi1>
    %cst = arith.constant dense<true> : vector<2x4x256xi1>
    %3 = arith.xori %2, %cst : vector<2x4x256xi1>
    %4 = arith.extui %3 : vector<2x4x256xi1> to vector<2x4x256xi32>
    %5 = arith.sitofp %4 : vector<2x4x256xi32> to vector<2x4x256xf32>
    %cst_5 = arith.constant dense<0x7F800000> : vector<2x4xf32>
    %6 = vector.multi_reduction <minimumf>, %5, %cst_5 [2] : vector<2x4x256xf32> to vector<2x4xf32>
    %7 = vector.shape_cast %6 : vector<2x4xf32> to vector<2x4x1xf32>
    %cst_6 = arith.constant dense<0x7F800000> : vector<2x1xf32>
    %8 = vector.multi_reduction <minimumf>, %7, %cst_6 [1] : vector<2x4x1xf32> to vector<2x1xf32>
    %9 = vector.shape_cast %8 : vector<2x1xf32> to vector<2x1x1xf32>
    %cst_7 = arith.constant dense<0x7F800000> : vector<1x1xf32>
    %10 = vector.multi_reduction <minimumf>, %9, %cst_7 [0] : vector<2x1x1xf32> to vector<1x1xf32>
    %11 = vector.shape_cast %10 : vector<1x1xf32> to vector<1x1x1xf32>
    %12 = vector.shape_cast %11 : vector<1x1x1xf32> to vector<1x1xf32>
    %13 = vector.shape_cast %12 : vector<1x1xf32> to vector<1x1xf32>
    %14 = vector.broadcast %13 : vector<1x1xf32> to vector<1x128xf32>
    %15 = arith.truncf %0 : vector<2x4x256xf32> to vector<2x4x256xbf16>
    "tpu.trace_start"() <{level = 10 : i32, message = "bci,bcj->bij"}> : () -> ()
    %cst_8 = arith.constant dense<0.000000e+00> : vector<2x256x256xf32>
    %16 = tpu.matmul %15, %15, %cst_8 {dimension_numbers = #tpu.dot_dimension_numbers<[1], [1], [2], [2], [0, 0, 0, 2, 1, 2], [0], [0]>} : vector<2x4x256xbf16>, vector<2x4x256xbf16>, vector<2x256x256xf32> -> vector<2x256x256xf32>
    "tpu.trace_stop"() : () -> ()
    %cst_9 = arith.constant dense<0xFF800000> : vector<2x256xf32>
    %17 = vector.multi_reduction <maximumf>, %16, %cst_9 [1] : vector<2x256x256xf32> to vector<2x256xf32>
    %18 = vector.shape_cast %17 : vector<2x256xf32> to vector<2x1x256xf32>
    %19 = vector.broadcast %18 : vector<2x1x256xf32> to vector<2x256x256xf32>
    %20 = arith.subf %16, %19 : vector<2x256x256xf32>
    %21 = math.exp %20 : vector<2x256x256xf32>
    %cst_10 = arith.constant dense<0.000000e+00> : vector<2x256xf32>
    %22 = vector.multi_reduction <add>, %21, %cst_10 [1] : vector<2x256x256xf32> to vector<2x256xf32>
    %23 = vector.shape_cast %22 : vector<2x256xf32> to vector<2x1x256xf32>
    %24 = arith.truncf %21 : vector<2x256x256xf32> to vector<2x256x256xbf16>
    %25 = tpu.reciprocal %23 {approx = true} : vector<2x1x256xf32> -> vector<2x1x256xf32>
    %26 = vector.extract_strided_slice %0 {offsets = [0, 0, 0], sizes = [1, 4, 256], strides = [1, 1, 1]} : vector<2x4x256xf32> to vector<1x4x256xf32>
    %27 = vector.shape_cast %26 : vector<1x4x256xf32> to vector<4x256xf32>
    %28 = arith.truncf %27 : vector<4x256xf32> to vector<4x256xbf16>
    %29 = vector.extract_strided_slice %24 {offsets = [0, 0, 0], sizes = [1, 256, 256], strides = [1, 1, 1]} : vector<2x256x256xbf16> to vector<1x256x256xbf16>
    %30 = vector.shape_cast %29 : vector<1x256x256xbf16> to vector<256x256xbf16>
    %cst_11 = arith.constant dense<0.000000e+00> : vector<4x256xf32>
    %31 = tpu.matmul %28, %30, %cst_11 {dimension_numbers = #tpu.dot_dimension_numbers<[1], [0], [0], [1], [0, 0, 1, 1], [], []>} : vector<4x256xbf16>, vector<256x256xbf16>, vector<4x256xf32> -> vector<4x256xf32>
    %32 = vector.extract_strided_slice %25 {offsets = [0, 0, 0], sizes = [1, 1, 256], strides = [1, 1, 1]} : vector<2x1x256xf32> to vector<1x1x256xf32>
    %33 = vector.shape_cast %32 : vector<1x1x256xf32> to vector<1x256xf32>
    %34 = vector.broadcast %33 : vector<1x256xf32> to vector<4x256xf32>
    %35 = arith.mulf %31, %34 : vector<4x256xf32>
    %36 = vector.extract_strided_slice %0 {offsets = [1, 0, 0], sizes = [1, 4, 256], strides = [1, 1, 1]} : vector<2x4x256xf32> to vector<1x4x256xf32>
    %37 = vector.shape_cast %36 : vector<1x4x256xf32> to vector<4x256xf32>
    %38 = arith.truncf %37 : vector<4x256xf32> to vector<4x256xbf16>
    %39 = vector.extract_strided_slice %24 {offsets = [1, 0, 0], sizes = [1, 256, 256], strides = [1, 1, 1]} : vector<2x256x256xbf16> to vector<1x256x256xbf16>
    %40 = vector.shape_cast %39 : vector<1x256x256xbf16> to vector<256x256xbf16>
    %cst_12 = arith.constant dense<0.000000e+00> : vector<4x256xf32>
    %41 = tpu.matmul %38, %40, %cst_12 {dimension_numbers = #tpu.dot_dimension_numbers<[1], [0], [0], [1], [0, 0, 1, 1], [], []>} : vector<4x256xbf16>, vector<256x256xbf16>, vector<4x256xf32> -> vector<4x256xf32>
    %42 = vector.extract_strided_slice %25 {offsets = [1, 0, 0], sizes = [1, 1, 256], strides = [1, 1, 1]} : vector<2x1x256xf32> to vector<1x1x256xf32>
    %43 = vector.shape_cast %42 : vector<1x1x256xf32> to vector<1x256xf32>
    %44 = vector.broadcast %43 : vector<1x256xf32> to vector<4x256xf32>
    %45 = arith.mulf %41, %44 : vector<4x256xf32>
    %46 = tpu.concatenate %35, %45 in 1 : vector<4x256xf32>, vector<4x256xf32> -> vector<4x512xf32>
    %47 = vector.extract_strided_slice %1 {offsets = [0, 0, 0], sizes = [1, 8, 4], strides = [1, 1, 1]} : vector<3x8x10xf32> to vector<1x8x4xf32>
    %48 = vector.shape_cast %47 : vector<1x8x4xf32> to vector<8x4xf32>
    %49 = vector.extract_strided_slice %1 {offsets = [0, 0, 8], sizes = [1, 8, 1], strides = [1, 1, 1]} : vector<3x8x10xf32> to vector<1x8x1xf32>
    %50 = vector.shape_cast %49 : vector<1x8x1xf32> to vector<8x1xf32>
    %51 = vector.extract_strided_slice %1 {offsets = [0, 0, 9], sizes = [1, 8, 1], strides = [1, 1, 1]} : vector<3x8x10xf32> to vector<1x8x1xf32>
    %52 = vector.shape_cast %51 : vector<1x8x1xf32> to vector<8x1xf32>
    %cst_13 = arith.constant dense<0.000000e+00> : vector<8x512xf32>
    %53 = tpu.matmul %48, %46, %cst_13 {dimension_numbers = #tpu.dot_dimension_numbers<[1], [0], [0], [1], [0, 0, 1, 1], [], []>} : vector<8x4xf32>, vector<4x512xf32>, vector<8x512xf32> -> vector<8x512xf32>
    %cst_14 = arith.constant dense<0.000000e+00> : vector<8xf32>
    %54 = vector.multi_reduction <add>, %53, %cst_14 [1] : vector<8x512xf32> to vector<8xf32>
    %55 = vector.shape_cast %54 : vector<8xf32> to vector<8x1xf32>
    %56 = arith.mulf %53, %53 : vector<8x512xf32>
    %cst_15 = arith.constant dense<0.000000e+00> : vector<8xf32>
    %57 = vector.multi_reduction <add>, %56, %cst_15 [1] : vector<8x512xf32> to vector<8xf32>
    %58 = vector.shape_cast %57 : vector<8xf32> to vector<8x1xf32>
    %cst_16 = arith.constant 0.001953125 : f32
    %59 = vector.broadcast %cst_16 : f32 to vector<8x1xf32>
    %60 = arith.mulf %55, %59 : vector<8x1xf32>
    %cst_17 = arith.constant 0.001953125 : f32
    %61 = vector.broadcast %cst_17 : f32 to vector<8x1xf32>
    %62 = arith.mulf %58, %61 : vector<8x1xf32>
    %63 = arith.mulf %60, %60 : vector<8x1xf32>
    %64 = arith.subf %62, %63 : vector<8x1xf32>
    %cst_18 = arith.constant 9.99999974E-6 : f32
    %65 = vector.broadcast %cst_18 : f32 to vector<8x1xf32>
    %66 = arith.addf %64, %65 : vector<8x1xf32>
    %67 = math.rsqrt %66 : vector<8x1xf32>
    %68 = arith.mulf %50, %67 : vector<8x1xf32>
    %69 = arith.mulf %60, %68 : vector<8x1xf32>
    %70 = arith.subf %52, %69 : vector<8x1xf32>
    %71 = vector.broadcast %68 : vector<8x1xf32> to vector<8x512xf32>
    %72 = arith.mulf %53, %71 : vector<8x512xf32>
    %73 = vector.broadcast %70 : vector<8x1xf32> to vector<8x512xf32>
    %74 = arith.addf %72, %73 : vector<8x512xf32>
    %cst_19 = arith.constant 0.000000e+00 : f32
    %75 = vector.broadcast %cst_19 : f32 to vector<8x512xf32>
    %76 = arith.maximumf %74, %75 : vector<8x512xf32>
    %77 = vector.extract_strided_slice %1 {offsets = [1, 0, 0], sizes = [1, 8, 8], strides = [1, 1, 1]} : vector<3x8x10xf32> to vector<1x8x8xf32>
    %78 = vector.shape_cast %77 : vector<1x8x8xf32> to vector<8x8xf32>
    %79 = vector.extract_strided_slice %1 {offsets = [1, 0, 8], sizes = [1, 8, 1], strides = [1, 1, 1]} : vector<3x8x10xf32> to vector<1x8x1xf32>
    %80 = vector.shape_cast %79 : vector<1x8x1xf32> to vector<8x1xf32>
    %81 = vector.extract_strided_slice %1 {offsets = [1, 0, 9], sizes = [1, 8, 1], strides = [1, 1, 1]} : vector<3x8x10xf32> to vector<1x8x1xf32>
    %82 = vector.shape_cast %81 : vector<1x8x1xf32> to vector<8x1xf32>
    %cst_20 = arith.constant dense<0.000000e+00> : vector<8x512xf32>
    %83 = tpu.matmul %78, %76, %cst_20 {dimension_numbers = #tpu.dot_dimension_numbers<[1], [0], [0], [1], [0, 0, 1, 1], [], []>} : vector<8x8xf32>, vector<8x512xf32>, vector<8x512xf32> -> vector<8x512xf32>
    %cst_21 = arith.constant dense<0.000000e+00> : vector<8xf32>
    %84 = vector.multi_reduction <add>, %83, %cst_21 [1] : vector<8x512xf32> to vector<8xf32>
    %85 = vector.shape_cast %84 : vector<8xf32> to vector<8x1xf32>
    %86 = arith.mulf %83, %83 : vector<8x512xf32>
    %cst_22 = arith.constant dense<0.000000e+00> : vector<8xf32>
    %87 = vector.multi_reduction <add>, %86, %cst_22 [1] : vector<8x512xf32> to vector<8xf32>
    %88 = vector.shape_cast %87 : vector<8xf32> to vector<8x1xf32>
    %cst_23 = arith.constant 0.001953125 : f32
    %89 = vector.broadcast %cst_23 : f32 to vector<8x1xf32>
    %90 = arith.mulf %85, %89 : vector<8x1xf32>
    %cst_24 = arith.constant 0.001953125 : f32
    %91 = vector.broadcast %cst_24 : f32 to vector<8x1xf32>
    %92 = arith.mulf %88, %91 : vector<8x1xf32>
    %93 = arith.mulf %90, %90 : vector<8x1xf32>
    %94 = arith.subf %92, %93 : vector<8x1xf32>
    %cst_25 = arith.constant 9.99999974E-6 : f32
    %95 = vector.broadcast %cst_25 : f32 to vector<8x1xf32>
    %96 = arith.addf %94, %95 : vector<8x1xf32>
    %97 = math.rsqrt %96 : vector<8x1xf32>
    %98 = arith.mulf %80, %97 : vector<8x1xf32>
    %99 = arith.mulf %90, %98 : vector<8x1xf32>
    %100 = arith.subf %82, %99 : vector<8x1xf32>
    %101 = vector.broadcast %98 : vector<8x1xf32> to vector<8x512xf32>
    %102 = arith.mulf %83, %101 : vector<8x512xf32>
    %103 = vector.broadcast %100 : vector<8x1xf32> to vector<8x512xf32>
    %104 = arith.addf %102, %103 : vector<8x512xf32>
    %cst_26 = arith.constant 0.000000e+00 : f32
    %105 = vector.broadcast %cst_26 : f32 to vector<8x512xf32>
    %106 = arith.maximumf %104, %105 : vector<8x512xf32>
    %107 = vector.extract_strided_slice %1 {offsets = [2, 0, 0], sizes = [1, 4, 8], strides = [1, 1, 1]} : vector<3x8x10xf32> to vector<1x4x8xf32>
    %108 = vector.shape_cast %107 : vector<1x4x8xf32> to vector<4x8xf32>
    %109 = vector.extract_strided_slice %1 {offsets = [2, 0, 8], sizes = [1, 4, 1], strides = [1, 1, 1]} : vector<3x8x10xf32> to vector<1x4x1xf32>
    %110 = vector.shape_cast %109 : vector<1x4x1xf32> to vector<4x1xf32>
    %111 = vector.extract_strided_slice %1 {offsets = [2, 0, 9], sizes = [1, 4, 1], strides = [1, 1, 1]} : vector<3x8x10xf32> to vector<1x4x1xf32>
    %112 = vector.shape_cast %111 : vector<1x4x1xf32> to vector<4x1xf32>
    %cst_27 = arith.constant dense<0.000000e+00> : vector<4x512xf32>
    %113 = tpu.matmul %108, %106, %cst_27 {dimension_numbers = #tpu.dot_dimension_numbers<[1], [0], [0], [1], [0, 0, 1, 1], [], []>} : vector<4x8xf32>, vector<8x512xf32>, vector<4x512xf32> -> vector<4x512xf32>
    %cst_28 = arith.constant dense<0.000000e+00> : vector<4xf32>
    %114 = vector.multi_reduction <add>, %113, %cst_28 [1] : vector<4x512xf32> to vector<4xf32>
    %115 = vector.shape_cast %114 : vector<4xf32> to vector<4x1xf32>
    %116 = arith.mulf %113, %113 : vector<4x512xf32>
    %cst_29 = arith.constant dense<0.000000e+00> : vector<4xf32>
    %117 = vector.multi_reduction <add>, %116, %cst_29 [1] : vector<4x512xf32> to vector<4xf32>
    %118 = vector.shape_cast %117 : vector<4xf32> to vector<4x1xf32>
    %cst_30 = arith.constant 0.001953125 : f32
    %119 = vector.broadcast %cst_30 : f32 to vector<4x1xf32>
    %120 = arith.mulf %115, %119 : vector<4x1xf32>
    %cst_31 = arith.constant 0.001953125 : f32
    %121 = vector.broadcast %cst_31 : f32 to vector<4x1xf32>
    %122 = arith.mulf %118, %121 : vector<4x1xf32>
    %123 = arith.mulf %120, %120 : vector<4x1xf32>
    %124 = arith.subf %122, %123 : vector<4x1xf32>
    %cst_32 = arith.constant 9.99999974E-6 : f32
    %125 = vector.broadcast %cst_32 : f32 to vector<4x1xf32>
    %126 = arith.addf %124, %125 : vector<4x1xf32>
    %127 = math.rsqrt %126 : vector<4x1xf32>
    %128 = arith.mulf %110, %127 : vector<4x1xf32>
    %129 = arith.mulf %120, %128 : vector<4x1xf32>
    %130 = arith.subf %112, %129 : vector<4x1xf32>
    %131 = vector.broadcast %128 : vector<4x1xf32> to vector<4x512xf32>
    %132 = arith.mulf %113, %131 : vector<4x512xf32>
    %133 = vector.broadcast %130 : vector<4x1xf32> to vector<4x512xf32>
    %134 = arith.addf %132, %133 : vector<4x512xf32>
    %cst_33 = arith.constant 0.000000e+00 : f32
    %135 = vector.broadcast %cst_33 : f32 to vector<4x512xf32>
    %136 = arith.maximumf %134, %135 : vector<4x512xf32>
    %137 = tpu.iota {dimensions = array<i32: 0>} : vector<4x4xi32>
    %138 = tpu.iota {dimensions = array<i32: 1>} : vector<4x4xi32>
    %139 = arith.cmpi eq, %137, %138 : vector<4x4xi32>
    %140 = arith.extui %139 : vector<4x4xi1> to vector<4x4xi32>
    %141 = arith.sitofp %140 : vector<4x4xi32> to vector<4x4xf32>
    %142 = tpu.iota {dimensions = array<i32: 1>} : vector<1x128xi32>
    %143 = vector.extract_strided_slice %136 {offsets = [0, 0], sizes = [4, 256], strides = [1, 1]} : vector<4x512xf32> to vector<4x256xf32>
    %cst_34 = arith.constant dense<0xFF800000> : vector<4xf32>
    %144 = vector.multi_reduction <maximumf>, %143, %cst_34 [1] : vector<4x256xf32> to vector<4xf32>
    %145 = vector.shape_cast %144 : vector<4xf32> to vector<4x1xf32>
    %146 = vector.broadcast %145 : vector<4x1xf32> to vector<4x256xf32>
    %147 = arith.subf %143, %146 : vector<4x256xf32>
    %148 = math.exp %147 : vector<4x256xf32>
    %cst_35 = arith.constant dense<0.000000e+00> : vector<4xf32>
    %149 = vector.multi_reduction <add>, %148, %cst_35 [1] : vector<4x256xf32> to vector<4xf32>
    %150 = vector.shape_cast %149 : vector<4xf32> to vector<4x1xf32>
    %151 = tpu.reciprocal %150 {approx = true} : vector<4x1xf32> -> vector<4x1xf32>
    %152 = vector.broadcast %151 : vector<4x1xf32> to vector<4x256xf32>
    %153 = arith.mulf %148, %152 : vector<4x256xf32>
    %c0_36 = arith.constant 0 : index
    %c0_37 = arith.constant 0 : index
    %c0_38 = arith.constant 0 : index
    %154 = vector.load %arg2[%c0_36, %c0_37, %c0_38] : memref<2x4x256xf32, #tpu.memory_space<vmem>>, vector<1x4x256xf32>
    %155 = vector.shape_cast %154 : vector<1x4x256xf32> to vector<4x256xf32>
    %156 = vector.shape_cast %153 : vector<4x256xf32> to vector<1x4x256xf32>
    tpu.vector_store %arg2[%c0_36, %c0_37, %c0_38], %156 {strides = array<i32>} : memref<2x4x256xf32, #tpu.memory_space<vmem>>, vector<1x4x256xf32>,
    "tpu.trace_start"() <{level = 10 : i32, message = "kn,jn->kj"}> : () -> ()
    %cst_39 = arith.constant dense<0.000000e+00> : vector<4x4xf32>
    %157 = tpu.matmul %153, %153, %cst_39 {dimension_numbers = #tpu.dot_dimension_numbers<[1], [1], [0], [0], [0, 0, 1, 0], [], []>} : vector<4x256xf32>, vector<4x256xf32>, vector<4x4xf32> -> vector<4x4xf32>
    "tpu.trace_stop"() : () -> ()
    %158 = arith.subf %141, %157 : vector<4x4xf32>
    %159 = arith.mulf %158, %158 : vector<4x4xf32>
    %cst_40 = arith.constant dense<0.000000e+00> : vector<4xf32>
    %160 = vector.multi_reduction <add>, %159, %cst_40 [1] : vector<4x4xf32> to vector<4xf32>
    %161 = vector.shape_cast %160 : vector<4xf32> to vector<4x1xf32>
    %cst_41 = arith.constant dense<0.000000e+00> : vector<1xf32>
    %162 = vector.multi_reduction <add>, %161, %cst_41 [0] : vector<4x1xf32> to vector<1xf32>
    %163 = vector.shape_cast %162 : vector<1xf32> to vector<1x1xf32>
    %164 = math.sqrt %163 : vector<1x1xf32>
    %165 = vector.shape_cast %164 : vector<1x1xf32> to vector<1x1xf32>
    %166 = vector.broadcast %165 : vector<1x1xf32> to vector<1x128xf32>
    %c1_i32 = arith.constant 1 : i32
    %167 = vector.broadcast %c1_i32 : i32 to vector<1x128xi32>
    %168 = arith.cmpi eq, %142, %167 : vector<1x128xi32>
    %169 = arith.select %168, %14, %166 : vector<1x128xi1>, vector<1x128xf32>
    %c0_42 = arith.constant 0 : index
    %c0_43 = arith.constant 0 : index
    %170 = vector.load %arg3[%c0_42, %c0_43] : memref<2x128xf32, #tpu.memory_space<vmem>>, vector<1x128xf32>
    tpu.vector_store %arg3[%c0_42, %c0_43], %169 {strides = array<i32>} : memref<2x128xf32, #tpu.memory_space<vmem>>, vector<1x128xf32>,
    %171 = vector.extract_strided_slice %136 {offsets = [0, 256], sizes = [4, 256], strides = [1, 1]} : vector<4x512xf32> to vector<4x256xf32>
    %cst_44 = arith.constant dense<0xFF800000> : vector<4xf32>
    %172 = vector.multi_reduction <maximumf>, %171, %cst_44 [1] : vector<4x256xf32> to vector<4xf32>
    %173 = vector.shape_cast %172 : vector<4xf32> to vector<4x1xf32>
    %174 = vector.broadcast %173 : vector<4x1xf32> to vector<4x256xf32>
    %175 = arith.subf %171, %174 : vector<4x256xf32>
    %176 = math.exp %175 : vector<4x256xf32>
    %cst_45 = arith.constant dense<0.000000e+00> : vector<4xf32>
    %177 = vector.multi_reduction <add>, %176, %cst_45 [1] : vector<4x256xf32> to vector<4xf32>
    %178 = vector.shape_cast %177 : vector<4xf32> to vector<4x1xf32>
    %179 = tpu.reciprocal %178 {approx = true} : vector<4x1xf32> -> vector<4x1xf32>
    %180 = vector.broadcast %179 : vector<4x1xf32> to vector<4x256xf32>
    %181 = arith.mulf %176, %180 : vector<4x256xf32>
    %c1 = arith.constant 1 : index
    %c0_46 = arith.constant 0 : index
    %c0_47 = arith.constant 0 : index
    %182 = vector.load %arg2[%c1, %c0_46, %c0_47] : memref<2x4x256xf32, #tpu.memory_space<vmem>>, vector<1x4x256xf32>
    %183 = vector.shape_cast %182 : vector<1x4x256xf32> to vector<4x256xf32>
    %184 = vector.shape_cast %181 : vector<4x256xf32> to vector<1x4x256xf32>
    tpu.vector_store %arg2[%c1, %c0_46, %c0_47], %184 {strides = array<i32>} : memref<2x4x256xf32, #tpu.memory_space<vmem>>, vector<1x4x256xf32>,
    "tpu.trace_start"() <{level = 10 : i32, message = "kn,jn->kj"}> : () -> ()
    %cst_48 = arith.constant dense<0.000000e+00> : vector<4x4xf32>
    %185 = tpu.matmul %181, %181, %cst_48 {dimension_numbers = #tpu.dot_dimension_numbers<[1], [1], [0], [0], [0, 0, 1, 0], [], []>} : vector<4x256xf32>, vector<4x256xf32>, vector<4x4xf32> -> vector<4x4xf32>
    "tpu.trace_stop"() : () -> ()
    %186 = arith.subf %141, %185 : vector<4x4xf32>
    %187 = arith.mulf %186, %186 : vector<4x4xf32>
    %cst_49 = arith.constant dense<0.000000e+00> : vector<4xf32>
    %188 = vector.multi_reduction <add>, %187, %cst_49 [1] : vector<4x4xf32> to vector<4xf32>
    %189 = vector.shape_cast %188 : vector<4xf32> to vector<4x1xf32>
    %cst_50 = arith.constant dense<0.000000e+00> : vector<1xf32>
    %190 = vector.multi_reduction <add>, %189, %cst_50 [0] : vector<4x1xf32> to vector<1xf32>
    %191 = vector.shape_cast %190 : vector<1xf32> to vector<1x1xf32>
    %192 = math.sqrt %191 : vector<1x1xf32>
    %193 = vector.shape_cast %192 : vector<1x1xf32> to vector<1x1xf32>
    %194 = vector.broadcast %193 : vector<1x1xf32> to vector<1x128xf32>
    %c1_i32_51 = arith.constant 1 : i32
    %195 = vector.broadcast %c1_i32_51 : i32 to vector<1x128xi32>
    %196 = arith.cmpi eq, %142, %195 : vector<1x128xi32>
    %197 = arith.select %196, %14, %194 : vector<1x128xi1>, vector<1x128xf32>
    %c1_52 = arith.constant 1 : index
    %c0_53 = arith.constant 0 : index
    %198 = vector.load %arg3[%c1_52, %c0_53] : memref<2x128xf32, #tpu.memory_space<vmem>>, vector<1x128xf32>
    tpu.vector_store %arg3[%c1_52, %c0_53], %197 {strides = array<i32>} : memref<2x128xf32, #tpu.memory_space<vmem>>, vector<1x128xf32>,
    return
  }
}

</mosaic_0001>

<bundles_post_ra>
// kernel: dpam_forward.1
= control target key start
LH: loop header
LB: loop body
LE: loop exit
PB: predicated region body
PF: predicated region fallthrough
CT: control target
= control target key end

     0   :  { %vm151_vm0 = vcmask 1041408   ;;  %v2703_v5 = vmov 0   ;;  %s4505_s0 = inlined_call_operand.vmem [shape: f32[2,4,256], index: 0, kind: input, shape index: {}]   ;;  %s4506_s1 = inlined_call_operand.vmem [shape: f32[3,8,10], index: 1, kind: input, shape index: {}]   ;;  %s4507_s2 = inlined_call_operand.hbm [shape: f32[2,4,256], index: 2, kind: output, shape index: {0}]   ;;  %s4508_s3 = inlined_call_operand.vmem [shape: f32[2,128], index: 3, kind: output, shape index: {1}]  }
   0x1   :  { %v15_v0 = vld [vmem:[%s4505_s0] sm:$0xff]  ;;  %v16_v1 = vld [vmem:[%s4505_s0 + $0x8] sm:$0xff]  ;;  %190 = vmatprep.mubr.bf16.mxu0 %v2703_v5 }
   0x2   :  { %v2738_v2 = vpack.c.bf16 %v15_v0, %v15_v0  ;;  %v62_v3 = vcombine.high %v15_v0, %v15_v0  ;;  %v63_v4 = vcombine.high %v16_v1, %v16_v1 }
   0x4   :  { %4713 = vst [vmem:[#allocation5_spill] sm:$0xff] %v2738_v2 }
   0x5   :  { %9 = vsyncpa [#allocation3], 0  ;;  %469 = vmatprep.mubr.bf16.mxu1 %v2703_v5  ;;  %70 = vxpose.xlu0.c.b16.start.end [1/1] (short) %v2738_v2, 128  ;;  %v2743_v6 = vpack.c.bf16 %v16_v1, %v16_v1  ;;  %v2745_v7 = vpack.c.bf16 %v62_v3, %v62_v3  ;;  %v153_v8 = vsel %vm151_vm0, %v2738_v2, 0  ;;  %v2749_v9 = vpack.c.bf16 %v63_v4, %v63_v4  ;;  %s2707_s18 = smov 1  }
   0x6   :  { %vm102_vm1 = vcmask 31744   ;;  %vm34_vm2 = vcmask 1043456   ;;  %vm1670_vm3 = vcmask 64512   ;;  %vm2708_vm6 = vmmov 1  }
   0x7   :  { %4714 = vst [vmem:[#allocation6_spill] sm:$0xff] %v2743_v6  ;;  %86 = vxpose.xlu1.c.b16.start.end [1/1] (short) %v2745_v7, 128  ;;  %2329 = vmatprep.subr.msk.bf16.mxu0 %vm151_vm0, %v2745_v7  ;;  %v432_v10 = vsel %vm151_vm0, %v2743_v6, 0  ;;  %vm2170_vm10 = vcmask 27648  }
   0x8   :  { %159 = vmatpush1.bf16.msra.mxu0 %v153_v8  ;;  %2346 = vmatprep.subr.msk.bf16.mxu1 %vm151_vm0, %v2749_v9 }
   0x9   :  { %438 = vmatpush1.bf16.msra.mxu1 %v432_v10 }
  0x22   :  { %351 = vxpose.xlu0.c.b16.start.end [1/1] (short) %v2743_v6, 128 }
  0x24   :  { %367 = vxpose.xlu1.c.b16.start.end [1/1] (short) %v2749_v9, 128 }
  0x6b   :  { %v78_v11 = vpop.trf.xlu0 }
  0x6c   :  { %2330 = vmatmul.mubr.msk.bf16.vlgmr.msra.gmra.mrb[0].mxu0 %vm102_vm1, %v78_v11 }
  0x6d   :  { %200 = vmatprep.mubr.bf16.mxu0 %v2703_v5  ;;  %v94_v22 = vpop.trf.xlu1 }
  0x6f   :  { %v79_v12 = vpop.trf.xlu0 }
  0x71   :  { %v95_v23 = vpop.trf.xlu1 }
  0x73   :  { %v80_v13 = vpop.trf.xlu0 }
  0x74   :  { %2331 = vmatmul.mubr.msk.bf16.gmra.mrb[4].mxu0 %vm102_vm1, %v79_v12 }
  0x75   :  { %210 = vmatprep.mubr.bf16.mxu0 %v2703_v5  ;;  %v96_v25 = vpop.trf.xlu1 }
  0x77   :  { %v81_v14 = vpop.trf.xlu0 }
  0x79   :  { %v97_v27 = vpop.trf.xlu1 }
  0x7b   :  { %v82_v15 = vpop.trf.xlu0 }
  0x7c   :  { %2332 = vmatmul.mubr.msk.bf16.gmra.mrb[8].mxu0 %vm102_vm1, %v80_v13 }
  0x7d   :  { %220 = vmatprep.mubr.bf16.mxu0 %v2703_v5  ;;  %v98_v29 = vpop.trf.xlu1 }
  0x7f   :  { %v83_v16 = vpop.trf.xlu0 }
  0x81   :  { %v99_v30 = vpop.trf.xlu1 }
  0x83   :  { %v84_v17 = vpop.trf.xlu0 }
  0x84   :  { %2333 = vmatmul.mubr.msk.bf16.gmra.mrb[12].mxu0 %vm102_vm1, %v81_v14 }
  0x85   :  { %230 = vmatprep.mubr.bf16.mxu0 %v2703_v5  ;;  %v100_v32 = vpop.trf.xlu1 }
  0x87   :  { %v85_v18 = vpop.trf.xlu0 }
  0x89   :  { %v101_v34 = vpop.trf.xlu1 }
  0x8b   :  { %v359_v19 = vpop.trf.xlu0 }
  0x8c   :  { %2334 = vmatmul.mubr.msk.bf16.gmra.mrb[16].mxu0 %vm102_vm1, %v82_v15  ;;  %2347 = vmatmul.mubr.msk.bf16.vlgmr.msra.gmra.mrb[0].mxu1 %vm102_vm1, %v359_v19 }
  0x8d   :  { %479 = vmatprep.mubr.bf16.mxu1 %v2703_v5  ;;  %240 = vmatprep.mubr.bf16.mxu0 %v2703_v5  ;;  %v375_v35 = vpop.trf.xlu1 }
  0x8f   :  { %v360_v20 = vpop.trf.xlu0 }
  0x91   :  { %v376_v36 = vpop.trf.xlu1 }
  0x93   :  { %v361_v21 = vpop.trf.xlu0 }
  0x94   :  { %2335 = vmatmul.mubr.msk.bf16.gmra.mrb[20].mxu0 %vm102_vm1, %v83_v16  ;;  %2348 = vmatmul.mubr.msk.bf16.gmra.mrb[4].mxu1 %vm102_vm1, %v360_v20 }
  0x95   :  { %489 = vmatprep.mubr.bf16.mxu1 %v2703_v5  ;;  %250 = vmatprep.mubr.bf16.mxu0 %v2703_v5  ;;  %v377_v37 = vpop.trf.xlu1 }
  0x97   :  { %v362_v24 = vpop.trf.xlu0 }
  0x99   :  { %v378_v38 = vpop.trf.xlu1 }
  0x9b   :  { %v363_v26 = vpop.trf.xlu0 }
  0x9c   :  { %2336 = vmatmul.mubr.msk.bf16.gmra.mrb[24].mxu0 %vm102_vm1, %v84_v17  ;;  %2349 = vmatmul.mubr.msk.bf16.gmra.mrb[8].mxu1 %vm102_vm1, %v361_v21 }
  0x9d   :  { %499 = vmatprep.mubr.bf16.mxu1 %v2703_v5  ;;  %260 = vmatprep.mubr.bf16.mxu0 %v2703_v5  ;;  %v379_v39 = vpop.trf.xlu1 }
  0x9f   :  { %v364_v28 = vpop.trf.xlu0 }
  0xa1   :  { %v380_v40 = vpop.trf.xlu1 }
  0xa3   :  { %v365_v31 = vpop.trf.xlu0 }
  0xa4   :  { %2337 = vmatmul.mubr.msk.bf16.gmra.mrb[28].mxu0 %vm102_vm1, %v85_v18  ;;  %2350 = vmatmul.mubr.msk.bf16.gmra.mrb[12].mxu1 %vm102_vm1, %v362_v24 }
  0xa5   :  { %509 = vmatprep.mubr.bf16.mxu1 %v2703_v5  ;;  %270 = vmatprep.mubr.bf16.mxu0 %v2703_v5  ;;  %v381_v41 = vpop.trf.xlu1 }
  0xa7   :  { %v366_v33 = vpop.trf.xlu0 }
  0xa9   :  { %v382_v42 = vpop.trf.xlu1 }
  0xac   :  { %2338 = vmatmul.mubr.msk.bf16.gmra.mrb[32].mxu0 %vm102_vm1, %v94_v22  ;;  %2351 = vmatmul.mubr.msk.bf16.gmra.mrb[16].mxu1 %vm102_vm1, %v363_v26 }
  0xad   :  { %519 = vmatprep.mubr.bf16.mxu1 %v2703_v5  ;;  %280 = vmatprep.mubr.bf16.mxu0 %v2703_v5 }
  0xb4   :  { %2339 = vmatmul.mubr.msk.bf16.gmra.mrb[36].mxu0 %vm102_vm1, %v95_v23  ;;  %2352 = vmatmul.mubr.msk.bf16.gmra.mrb[20].mxu1 %vm102_vm1, %v364_v28 }
  0xb5   :  { %529 = vmatprep.mubr.bf16.mxu1 %v2703_v5  ;;  %290 = vmatprep.mubr.bf16.mxu0 %v2703_v5 }
  0xbc   :  { %2340 = vmatmul.mubr.msk.bf16.gmra.mrb[40].mxu0 %vm102_vm1, %v96_v25  ;;  %2353 = vmatmul.mubr.msk.bf16.gmra.mrb[24].mxu1 %vm102_vm1, %v365_v31 }
  0xbd   :  { %539 = vmatprep.mubr.bf16.mxu1 %v2703_v5  ;;  %300 = vmatprep.mubr.bf16.mxu0 %v2703_v5 }
  0xc4   :  { %2341 = vmatmul.mubr.msk.bf16.gmra.mrb[44].mxu0 %vm102_vm1, %v97_v27  ;;  %2354 = vmatmul.mubr.msk.bf16.gmra.mrb[28].mxu1 %vm102_vm1, %v366_v33 }
  0xc5   :  { %549 = vmatprep.mubr.bf16.mxu1 %v2703_v5  ;;  %310 = vmatprep.mubr.bf16.mxu0 %v2703_v5 }
  0xcc   :  { %2342 = vmatmul.mubr.msk.bf16.gmra.mrb[48].mxu0 %vm102_vm1, %v98_v29  ;;  %2355 = vmatmul.mubr.msk.bf16.gmra.mrb[32].mxu1 %vm102_vm1, %v375_v35 }
  0xcd   :  { %559 = vmatprep.mubr.bf16.mxu1 %v2703_v5  ;;  %320 = vmatprep.mubr.bf16.mxu0 %v2703_v5 }
  0xd4   :  { %2343 = vmatmul.mubr.msk.bf16.gmra.mrb[52].mxu0 %vm102_vm1, %v99_v30  ;;  %2356 = vmatmul.mubr.msk.bf16.gmra.mrb[36].mxu1 %vm102_vm1, %v376_v36 }
  0xd5   :  { %569 = vmatprep.mubr.bf16.mxu1 %v2703_v5  ;;  %330 = vmatprep.mubr.bf16.mxu0 %v2703_v5 }
  0xdc   :  { %2344 = vmatmul.mubr.msk.bf16.gmra.mrb[56].mxu0 %vm102_vm1, %v100_v32  ;;  %2357 = vmatmul.mubr.msk.bf16.gmra.mrb[40].mxu1 %vm102_vm1, %v377_v37 }
  0xdd   :  { %579 = vmatprep.mubr.bf16.mxu1 %v2703_v5  ;;  %340 = vmatprep.mubr.bf16.mxu0 %v2703_v5 }
  0xe4   :  { %2345 = vmatmul.mubr.msk.bf16.gmra.mrb[60].mxu0 %vm102_vm1, %v101_v34  ;;  %2358 = vmatmul.mubr.msk.bf16.gmra.mrb[44].mxu1 %vm102_vm1, %v378_v38 }
  0xe5   :  { %589 = vmatprep.mubr.bf16.mxu1 %v2703_v5  ;;  %1410 = vmatprep.mubr.bf16.mxu0 %v2745_v7 }
  0xec   :  { %2359 = vmatmul.mubr.msk.bf16.gmra.mrb[48].mxu1 %vm102_vm1, %v379_v39 }
  0xed   :  { %599 = vmatprep.mubr.bf16.mxu1 %v2703_v5 }
  0xf4   :  { %2360 = vmatmul.mubr.msk.bf16.gmra.mrb[52].mxu1 %vm102_vm1, %v380_v40 }
  0xf5   :  { %609 = vmatprep.mubr.bf16.mxu1 %v2703_v5 }
  0xfc   :  { %2361 = vmatmul.mubr.msk.bf16.gmra.mrb[56].mxu1 %vm102_vm1, %v381_v41 }
  0xfd   :  { %619 = vmatprep.mubr.bf16.mxu1 %v2703_v5 }
 0x104   :  { %2362 = vmatmul.mubr.msk.bf16.gmra.mrb[60].mxu1 %vm102_vm1, %v382_v42 }
 0x105   :  { %1453 = vmatprep.mubr.bf16.mxu1 %v2749_v9 }
 0x13f   :  { %v2824_v43 = vpop.f32.mrb[0].mxu0 }
 0x140   :  { %v2826_v44 = vpop.f32.mrb[1].mxu0 }
 0x141   :  { %v2828_v45 = vpop.f32.mrb[2].mxu0 }
 0x142   :  { %v630_v46 = vmax.f32 %v2824_v43, %v2828_v45  ;;  %v2832_v47 = vpop.f32.mrb[3].mxu0 }
 0x143   :  { %v667_v48 = vmax.f32 %v2826_v44, %v2832_v47 }
 0x147   :  { %v2836_v49 = vpop.f32.mrb[4].mxu0 }
 0x148   :  { %v631_v50 = vmax.f32 %v630_v46, %v2836_v49  ;;  %v2839_v51 = vpop.f32.mrb[5].mxu0 }
 0x149   :  { %v668_v52 = vmax.f32 %v667_v48, %v2839_v51  ;;  %v2842_v53 = vpop.f32.mrb[6].mxu0 }
 0x14a   :  { %v632_v54 = vmax.f32 %v631_v50, %v2842_v53  ;;  %v2845_v55 = vpop.f32.mrb[7].mxu0 }
 0x14b   :  { %v669_v56 = vmax.f32 %v668_v52, %v2845_v55 }
 0x14f   :  { %v2848_v57 = vpop.f32.mrb[8].mxu0 }
 0x150   :  { %v633_v58 = vmax.f32 %v632_v54, %v2848_v57  ;;  %v2851_v59 = vpop.f32.mrb[9].mxu0 }
 0x151   :  { %v670_v60 = vmax.f32 %v669_v56, %v2851_v59  ;;  %v2854_v61 = vpop.f32.mrb[10].mxu0 }
 0x152   :  { %v634_v62 = vmax.f32 %v633_v58, %v2854_v61  ;;  %v2857_v63 = vpop.f32.mrb[11].mxu0 }
 0x153   :  { %v671_v0 = vmax.f32 %v670_v60, %v2857_v63 }
 0x157   :  { %v2860_v1 = vpop.f32.mrb[12].mxu0 }
 0x158   :  { %v635_v3 = vmax.f32 %v634_v62, %v2860_v1  ;;  %v2863_v4 = vpop.f32.mrb[13].mxu0 }
 0x159   :  { %v672_v5 = vmax.f32 %v671_v0, %v2863_v4  ;;  %v2866_v7 = vpop.f32.mrb[14].mxu0 }
 0x15a   :  { %v636_v8 = vmax.f32 %v635_v3, %v2866_v7  ;;  %v2869_v9 = vpop.f32.mrb[15].mxu0 }
 0x15b   :  { %v673_v10 = vmax.f32 %v672_v5, %v2869_v9 }
 0x15f   :  { %v2872_v11 = vpop.f32.mrb[16].mxu0  ;;  %v2874_v12 = vpop.f32.mrb[0].mxu1 }
 0x160   :  { %4715 = vst [vmem:[#allocation7_spill] sm:$0xff] %v2874_v12  ;;  %v637_v13 = vmax.f32 %v636_v8, %v2872_v11  ;;  %v2877_v14 = vpop.f32.mrb[17].mxu0  ;;  %v2879_v15 = vpop.f32.mrb[1].mxu1 }
 0x161   :  { %4716 = vst [vmem:[#allocation8_spill] sm:$0xff] %v2879_v15  ;;  %v674_v16 = vmax.f32 %v673_v10, %v2877_v14  ;;  %v2882_v17 = vpop.f32.mrb[18].mxu0  ;;  %v2884_v18 = vpop.f32.mrb[2].mxu1 }
 0x162   :  { %4717 = vst [vmem:[#allocation9_spill] sm:$0xff] %v2884_v18  ;;  %v638_v19 = vmax.f32 %v637_v13, %v2882_v17  ;;  %v704_v20 = vmax.f32 %v2874_v12, %v2884_v18  ;;  %v2889_v21 = vpop.f32.mrb[19].mxu0  ;;  %v2891_v22 = vpop.f32.mrb[3].mxu1 }
 0x163   :  { %4718 = vst [vmem:[#allocation10_spill] sm:$0xff] %v2891_v22  ;;  %v675_v23 = vmax.f32 %v674_v16, %v2889_v21  ;;  %v741_v24 = vmax.f32 %v2879_v15, %v2891_v22 }
 0x167   :  { %v2896_v25 = vpop.f32.mrb[20].mxu0  ;;  %v2898_v26 = vpop.f32.mrb[4].mxu1 }
 0x168   :  { %4719 = vst [vmem:[#allocation11_spill] sm:$0xff] %v2898_v26  ;;  %v639_v27 = vmax.f32 %v638_v19, %v2896_v25  ;;  %v705_v28 = vmax.f32 %v704_v20, %v2898_v26  ;;  %v2902_v29 = vpop.f32.mrb[21].mxu0  ;;  %v2904_v30 = vpop.f32.mrb[5].mxu1 }
 0x169   :  { %4720 = vst [vmem:[#allocation12_spill] sm:$0xff] %v2904_v30  ;;  %v676_v31 = vmax.f32 %v675_v23, %v2902_v29  ;;  %v742_v32 = vmax.f32 %v741_v24, %v2904_v30  ;;  %v2908_v33 = vpop.f32.mrb[22].mxu0  ;;  %v2910_v34 = vpop.f32.mrb[6].mxu1 }
 0x16a   :  { %4721 = vst [vmem:[#allocation13_spill] sm:$0xff] %v2910_v34  ;;  %v640_v35 = vmax.f32 %v639_v27, %v2908_v33  ;;  %v706_v36 = vmax.f32 %v705_v28, %v2910_v34  ;;  %v2914_v37 = vpop.f32.mrb[23].mxu0  ;;  %v2916_v38 = vpop.f32.mrb[7].mxu1 }
 0x16b   :  { %4722 = vst [vmem:[#allocation14_spill] sm:$0xff] %v2916_v38  ;;  %v677_v39 = vmax.f32 %v676_v31, %v2914_v37  ;;  %v743_v40 = vmax.f32 %v742_v32, %v2916_v38 }
 0x16f   :  { %v2920_v41 = vpop.f32.mrb[24].mxu0  ;;  %v2922_v42 = vpop.f32.mrb[8].mxu1 }
 0x170   :  { %4723 = vst [vmem:[#allocation15_spill] sm:$0xff] %v2922_v42  ;;  %v641_v46 = vmax.f32 %v640_v35, %v2920_v41  ;;  %v707_v48 = vmax.f32 %v706_v36, %v2922_v42  ;;  %v2926_v50 = vpop.f32.mrb[25].mxu0  ;;  %v2928_v52 = vpop.f32.mrb[9].mxu1 }
 0x171   :  { %4724 = vst [vmem:[#allocation16_spill] sm:$0xff] %v2928_v52  ;;  %v678_v54 = vmax.f32 %v677_v39, %v2926_v50  ;;  %v744_v56 = vmax.f32 %v743_v40, %v2928_v52  ;;  %v2932_v58 = vpop.f32.mrb[26].mxu0  ;;  %v2934_v60 = vpop.f32.mrb[10].mxu1 }
 0x172   :  { %4725 = vst [vmem:[#allocation17_spill] sm:$0xff] %v2934_v60  ;;  %v642_v62 = vmax.f32 %v641_v46, %v2932_v58  ;;  %v708_v0 = vmax.f32 %v707_v48, %v2934_v60  ;;  %v2938_v3 = vpop.f32.mrb[27].mxu0  ;;  %v2940_v5 = vpop.f32.mrb[11].mxu1 }
 0x173   :  { %4726 = vst [vmem:[#allocation18_spill] sm:$0xff] %v2938_v3  ;;  %4727 = vst [vmem:[#allocation19_spill] sm:$0xff] %v2940_v5  ;;  %v679_v8 = vmax.f32 %v678_v54, %v2938_v3  ;;  %v745_v10 = vmax.f32 %v744_v56, %v2940_v5 }
 0x177   :  { %v2944_v13 = vpop.f32.mrb[28].mxu0  ;;  %v2946_v16 = vpop.f32.mrb[12].mxu1 }
 0x178   :  { %4728 = vst [vmem:[#allocation20_spill] sm:$0xff] %v2946_v16  ;;  %v643_v19 = vmax.f32 %v642_v62, %v2944_v13  ;;  %v709_v20 = vmax.f32 %v708_v0, %v2946_v16  ;;  %v2950_v23 = vpop.f32.mrb[29].mxu0  ;;  %v2952_v24 = vpop.f32.mrb[13].mxu1 }
 0x179   :  { %4729 = vst [vmem:[#allocation21_spill] sm:$0xff] %v2950_v23  ;;  %4730 = vst [vmem:[#allocation22_spill] sm:$0xff] %v2952_v24  ;;  %v680_v27 = vmax.f32 %v679_v8, %v2950_v23  ;;  %v746_v28 = vmax.f32 %v745_v10, %v2952_v24  ;;  %v2956_v31 = vpop.f32.mrb[30].mxu0  ;;  %v2958_v32 = vpop.f32.mrb[14].mxu1 }
 0x17a   :  { %4731 = vst [vmem:[#allocation23_spill] sm:$0xff] %v2958_v32  ;;  %v644_v35 = vmax.f32 %v643_v19, %v2956_v31  ;;  %v710_v36 = vmax.f32 %v709_v20, %v2958_v32  ;;  %v2962_v39 = vpop.f32.mrb[31].mxu0  ;;  %v2964_v40 = vpop.f32.mrb[15].mxu1 }
 0x17b   :  { %4732 = vst [vmem:[#allocation24_spill] sm:$0xff] %v2962_v39  ;;  %4733 = vst [vmem:[#allocation25_spill] sm:$0xff] %v2964_v40  ;;  %v681_v46 = vmax.f32 %v680_v27, %v2962_v39  ;;  %v747_v48 = vmax.f32 %v746_v28, %v2964_v40 }
 0x17f   :  { %v2968_v54 = vpop.f32.mrb[32].mxu0  ;;  %v2970_v56 = vpop.f32.mrb[16].mxu1 }
 0x180   :  { %4734 = vst [vmem:[#allocation26_spill] sm:$0xff] %v2970_v56  ;;  %v645_v62 = vmax.f32 %v644_v35, %v2968_v54  ;;  %v711_v0 = vmax.f32 %v710_v36, %v2970_v56  ;;  %v2974_v8 = vpop.f32.mrb[33].mxu0  ;;  %v2976_v10 = vpop.f32.mrb[17].mxu1 }
 0x181   :  { %4735 = vst [vmem:[#allocation27_spill] sm:$0xff] %v2974_v8  ;;  %4736 = vst [vmem:[#allocation28_spill] sm:$0xff] %v2976_v10  ;;  %v682_v19 = vmax.f32 %v681_v46, %v2974_v8  ;;  %v748_v20 = vmax.f32 %v747_v48, %v2976_v10  ;;  %v2980_v6 = vpop.f32.mrb[34].mxu0  ;;  %v2982_v27 = vpop.f32.mrb[18].mxu1 }
 0x182   :  { %4737 = vst [vmem:[#allocation29_spill] sm:$0xff] %v2982_v27  ;;  %v646_v28 = vmax.f32 %v645_v62, %v2980_v6  ;;  %v712_v2 = vmax.f32 %v711_v0, %v2982_v27  ;;  %v2986_v40 = vpop.f32.mrb[35].mxu0  ;;  %v2988_v35 = vpop.f32.mrb[19].mxu1 }
 0x183   :  { %4738 = vst [vmem:[#allocation30_spill] sm:$0xff] %v2986_v40  ;;  %4739 = vst [vmem:[#allocation31_spill] sm:$0xff] %v2988_v35  ;;  %v683_v36 = vmax.f32 %v682_v19, %v2986_v40  ;;  %v749_v24 = vmax.f32 %v748_v20, %v2988_v35 }
 0x187   :  { %v2992_v5 = vpop.f32.mrb[36].mxu0  ;;  %v2994_v46 = vpop.f32.mrb[20].mxu1 }
 0x188   :  { %4740 = vst [vmem:[#allocation32_spill] sm:$0xff] %v2994_v46  ;;  %v647_v48 = vmax.f32 %v646_v28, %v2992_v5  ;;  %v713_v10 = vmax.f32 %v712_v2, %v2994_v46  ;;  %v2998_v52 = vpop.f32.mrb[37].mxu0  ;;  %v3000_v62 = vpop.f32.mrb[21].mxu1 }
 0x189   :  { %4741 = vst [vmem:[#allocation33_spill] sm:$0xff] %v2998_v52  ;;  %4742 = vst [vmem:[#allocation34_spill] sm:$0xff] %v3000_v62  ;;  %v684_v0 = vmax.f32 %v683_v36, %v2998_v52  ;;  %v750_v38 = vmax.f32 %v749_v24, %v3000_v62  ;;  %v3004_v30 = vpop.f32.mrb[38].mxu0  ;;  %v3006_v19 = vpop.f32.mrb[22].mxu1 }
 0x18a   :  { %4743 = vst [vmem:[#allocation35_spill] sm:$0xff] %v3006_v19  ;;  %v648_v20 = vmax.f32 %v647_v48, %v3004_v30  ;;  %v714_v35 = vmax.f32 %v713_v10, %v3006_v19  ;;  %v3010_v22 = vpop.f32.mrb[39].mxu0  ;;  %v3012_v28 = vpop.f32.mrb[23].mxu1 }
 0x18b   :  { %4744 = vst [vmem:[#allocation36_spill] sm:$0xff] %v3010_v22  ;;  %4745 = vst [vmem:[#allocation37_spill] sm:$0xff] %v3012_v28  ;;  %v685_v2 = vmax.f32 %v684_v0, %v3010_v22  ;;  %v751_v15 = vmax.f32 %v750_v38, %v3012_v28 }
 0x18f   :  { %v3016_v46 = vpop.f32.mrb[40].mxu0  ;;  %v3018_v36 = vpop.f32.mrb[24].mxu1 }
 0x190   :  { %4746 = vst [vmem:[#allocation38_spill] sm:$0xff] %v3018_v36  ;;  %v649_v24 = vmax.f32 %v648_v20, %v3016_v46  ;;  %v715_v62 = vmax.f32 %v714_v35, %v3018_v36  ;;  %v3022_v27 = vpop.f32.mrb[41].mxu0  ;;  %v3024_v48 = vpop.f32.mrb[25].mxu1 }
 0x191   :  { %4747 = vst [vmem:[#allocation39_spill] sm:$0xff] %v3022_v27  ;;  %4748 = vst [vmem:[#allocation40_spill] sm:$0xff] %v3024_v48  ;;  %v686_v10 = vmax.f32 %v685_v2, %v3022_v27  ;;  %v752_v19 = vmax.f32 %v751_v15, %v3024_v48  ;;  %v3028_v56 = vpop.f32.mrb[42].mxu0  ;;  %v3030_v0 = vpop.f32.mrb[26].mxu1 }
 0x192   :  { %4749 = vst [vmem:[#allocation41_spill] sm:$0xff] %v3030_v0  ;;  %v650_v38 = vmax.f32 %v649_v24, %v3028_v56  ;;  %v716_v28 = vmax.f32 %v715_v62, %v3030_v0  ;;  %v3034_v32 = vpop.f32.mrb[43].mxu0  ;;  %v3036_v20 = vpop.f32.mrb[27].mxu1 }
 0x193   :  { %4750 = vst [vmem:[#allocation42_spill] sm:$0xff] %v3034_v32  ;;  %4751 = vst [vmem:[#allocation43_spill] sm:$0xff] %v3036_v20  ;;  %v687_v35 = vmax.f32 %v686_v10, %v3034_v32  ;;  %v753_v36 = vmax.f32 %v752_v19, %v3036_v20 }
 0x197   :  { %v3040_v16 = vpop.f32.mrb[44].mxu0  ;;  %v3042_v2 = vpop.f32.mrb[28].mxu1 }
 0x198   :  { %4752 = vst [vmem:[#allocation44_spill] sm:$0xff] %v3042_v2  ;;  %v651_v15 = vmax.f32 %v650_v38, %v3040_v16  ;;  %v717_v48 = vmax.f32 %v716_v28, %v3042_v2  ;;  %v3046_v60 = vpop.f32.mrb[45].mxu0  ;;  %v3048_v24 = vpop.f32.mrb[29].mxu1 }
 0x199   :  { %4753 = vst [vmem:[#allocation45_spill] sm:$0xff] %v3046_v60  ;;  %4754 = vst [vmem:[#allocation46_spill] sm:$0xff] %v3048_v24  ;;  %v688_v62 = vmax.f32 %v687_v35, %v3046_v60  ;;  %v754_v0 = vmax.f32 %v753_v36, %v3048_v24  ;;  %v3052_v42 = vpop.f32.mrb[46].mxu0  ;;  %v3054_v10 = vpop.f32.mrb[30].mxu1 }
 0x19a   :  { %4755 = vst [vmem:[#allocation47_spill] sm:$0xff] %v3054_v10  ;;  %v652_v19 = vmax.f32 %v651_v15, %v3052_v42  ;;  %v718_v20 = vmax.f32 %v717_v48, %v3054_v10  ;;  %v3058_v34 = vpop.f32.mrb[47].mxu0  ;;  %v3060_v38 = vpop.f32.mrb[31].mxu1 }
 0x19b   :  { %4756 = vst [vmem:[#allocation48_spill] sm:$0xff] %v3058_v34  ;;  %4757 = vst [vmem:[#allocation49_spill] sm:$0xff] %v3060_v38  ;;  %v689_v28 = vmax.f32 %v688_v62, %v3058_v34  ;;  %v755_v2 = vmax.f32 %v754_v0, %v3060_v38 }
 0x19f   :  { %v3064_v26 = vpop.f32.mrb[48].mxu0  ;;  %v3066_v35 = vpop.f32.mrb[32].mxu1 }
 0x1a0   :  { %4758 = vst [vmem:[#allocation50_spill] sm:$0xff] %v3066_v35  ;;  %v653_v36 = vmax.f32 %v652_v19, %v3064_v26  ;;  %v719_v24 = vmax.f32 %v718_v20, %v3066_v35  ;;  %v3070_v18 = vpop.f32.mrb[49].mxu0  ;;  %v3072_v15 = vpop.f32.mrb[33].mxu1 }
 0x1a1   :  { %4759 = vst [vmem:[#allocation51_spill] sm:$0xff] %v3070_v18  ;;  %4760 = vst [vmem:[#allocation52_spill] sm:$0xff] %v3072_v15  ;;  %v690_v48 = vmax.f32 %v689_v28, %v3070_v18  ;;  %v756_v10 = vmax.f32 %v755_v2, %v3072_v15  ;;  %v3076_v12 = vpop.f32.mrb[50].mxu0  ;;  %v3078_v62 = vpop.f32.mrb[34].mxu1 }
 0x1a2   :  { %4761 = vst [vmem:[#allocation53_spill] sm:$0xff] %v3078_v62  ;;  %v654_v0 = vmax.f32 %v653_v36, %v3076_v12  ;;  %v720_v38 = vmax.f32 %v719_v24, %v3078_v62  ;;  %v3082_v34 = vpop.f32.mrb[51].mxu0  ;;  %v3084_v19 = vpop.f32.mrb[35].mxu1 }
 0x1a3   :  { %4762 = vst [vmem:[#allocation54_spill] sm:$0xff] %v3082_v34  ;;  %4763 = vst [vmem:[#allocation55_spill] sm:$0xff] %v3084_v19  ;;  %v691_v20 = vmax.f32 %v690_v48, %v3082_v34  ;;  %v757_v35 = vmax.f32 %v756_v10, %v3084_v19 }
 0x1a7   :  { %v3088_v60 = vpop.f32.mrb[52].mxu0  ;;  %v3090_v28 = vpop.f32.mrb[36].mxu1 }
 0x1a8   :  { %4764 = vst [vmem:[#allocation56_spill] sm:$0xff] %v3090_v28  ;;  %v655_v2 = vmax.f32 %v654_v0, %v3088_v60  ;;  %v721_v15 = vmax.f32 %v720_v38, %v3090_v28  ;;  %v3094_v18 = vpop.f32.mrb[53].mxu0  ;;  %v3096_v36 = vpop.f32.mrb[37].mxu1 }
 0x1a9   :  { %4765 = vst [vmem:[#allocation57_spill] sm:$0xff] %v3094_v18  ;;  %4766 = vst [vmem:[#allocation58_spill] sm:$0xff] %v3096_v36  ;;  %v692_v24 = vmax.f32 %v691_v20, %v3094_v18  ;;  %v758_v62 = vmax.f32 %v757_v35, %v3096_v36  ;;  %v3100_v32 = vpop.f32.mrb[54].mxu0  ;;  %v3102_v48 = vpop.f32.mrb[38].mxu1 }
 0x1aa   :  { %4767 = vst [vmem:[#allocation59_spill] sm:$0xff] %v3102_v48  ;;  %v656_v10 = vmax.f32 %v655_v2, %v3100_v32  ;;  %v722_v19 = vmax.f32 %v721_v15, %v3102_v48  ;;  %v3106_v34 = vpop.f32.mrb[55].mxu0  ;;  %v3108_v0 = vpop.f32.mrb[39].mxu1 }
 0x1ab   :  { %4768 = vst [vmem:[#allocation60_spill] sm:$0xff] %v3106_v34  ;;  %4769 = vst [vmem:[#allocation61_spill] sm:$0xff] %v3108_v0  ;;  %v693_v38 = vmax.f32 %v692_v24, %v3106_v34  ;;  %v759_v28 = vmax.f32 %v758_v62, %v3108_v0 }
 0x1af   :  { %v3112_v27 = vpop.f32.mrb[56].mxu0  ;;  %v3114_v20 = vpop.f32.mrb[40].mxu1 }
 0x1b0   :  { %4770 = vst [vmem:[#allocation62_spill] sm:$0xff] %v3114_v20  ;;  %v657_v35 = vmax.f32 %v656_v10, %v3112_v27  ;;  %v723_v36 = vmax.f32 %v722_v19, %v3114_v20  ;;  %v3118_v18 = vpop.f32.mrb[57].mxu0  ;;  %v3120_v2 = vpop.f32.mrb[41].mxu1 }
 0x1b1   :  { %4771 = vst [vmem:[#allocation63_spill] sm:$0xff] %v3118_v18  ;;  %4772 = vst [vmem:[#allocation64_spill] sm:$0xff] %v3120_v2  ;;  %v694_v15 = vmax.f32 %v693_v38, %v3118_v18  ;;  %v760_v48 = vmax.f32 %v759_v28, %v3120_v2  ;;  %v3124_v22 = vpop.f32.mrb[58].mxu0  ;;  %v3126_v24 = vpop.f32.mrb[42].mxu1 }
 0x1b2   :  { %4773 = vst [vmem:[#allocation65_spill] sm:$0xff] %v3126_v24  ;;  %v658_v62 = vmax.f32 %v657_v35, %v3124_v22  ;;  %v724_v0 = vmax.f32 %v723_v36, %v3126_v24  ;;  %v3130_v34 = vpop.f32.mrb[59].mxu0  ;;  %v3132_v10 = vpop.f32.mrb[43].mxu1 }
 0x1b3   :  { %4774 = vst [vmem:[#allocation66_spill] sm:$0xff] %v3130_v34  ;;  %4775 = vst [vmem:[#allocation67_spill] sm:$0xff] %v3132_v10  ;;  %v695_v19 = vmax.f32 %v694_v15, %v3130_v34  ;;  %v761_v20 = vmax.f32 %v760_v48, %v3132_v10 }
 0x1b7   :  { %v3136_v52 = vpop.f32.mrb[60].mxu0  ;;  %v3138_v38 = vpop.f32.mrb[44].mxu1 }
 0x1b8   :  { %4776 = vst [vmem:[#allocation68_spill] sm:$0xff] %v3138_v38  ;;  %v659_v28 = vmax.f32 %v658_v62, %v3136_v52  ;;  %v725_v2 = vmax.f32 %v724_v0, %v3138_v38  ;;  %v3142_v18 = vpop.f32.mrb[61].mxu0  ;;  %v3144_v35 = vpop.f32.mrb[45].mxu1 }
 0x1b9   :  { %4777 = vst [vmem:[#allocation69_spill] sm:$0xff] %v3142_v18  ;;  %4778 = vst [vmem:[#allocation70_spill] sm:$0xff] %v3144_v35  ;;  %v696_v36 = vmax.f32 %v695_v19, %v3142_v18  ;;  %v762_v24 = vmax.f32 %v761_v20, %v3144_v35  ;;  %v3148_v40 = vpop.f32.mrb[62].mxu0  ;;  %v3150_v15 = vpop.f32.mrb[46].mxu1 }
 0x1ba   :  { %4779 = vst [vmem:[#allocation71_spill] sm:$0xff] %v3150_v15  ;;  %v660_v48 = vmax.f32 %v659_v28, %v3148_v40  ;;  %v726_v10 = vmax.f32 %v725_v2, %v3150_v15  ;;  %v3154_v34 = vpop.f32.mrb[63].mxu0  ;;  %v3156_v62 = vpop.f32.mrb[47].mxu1 }
 0x1bb   :  { %4780 = vst [vmem:[#allocation72_spill] sm:$0xff] %v3154_v34  ;;  %4781 = vst [vmem:[#allocation73_spill] sm:$0xff] %v3156_v62  ;;  %v697_v0 = vmax.f32 %v696_v36, %v3154_v34  ;;  %v763_v38 = vmax.f32 %v762_v24, %v3156_v62 }
 0x1bc   :  { %v661_v8 = vrot.slane %v660_v48, 4 }
 0x1bd   :  { %v698_v19 = vrot.slane %v697_v0, 4 }
 0x1be   :  { %v662_v18 = vmax.f32 %v660_v48, %v661_v8 }
 0x1bf   :  { %v699_v20 = vmax.f32 %v697_v0, %v698_v19  ;;  %v3160_v35 = vpop.f32.mrb[48].mxu1 }
 0x1c0   :  { %4782 = vst [vmem:[#allocation74_spill] sm:$0xff] %v3160_v35  ;;  %v663_v39 = vrot.slane %v662_v18, 2  ;;  %v3163_v23 = vmax.f32 %v726_v10, %v3160_v35  ;;  %v3165_v28 = vpop.f32.mrb[49].mxu1 }
 0x1c1   :  { %4783 = vst [vmem:[#allocation75_spill] sm:$0xff] %v3165_v28  ;;  %v700_v2 = vrot.slane %v699_v20, 2  ;;  %v3168_v15 = vmax.f32 %v763_v38, %v3165_v28  ;;  %v3170_v3 = vpop.f32.mrb[50].mxu1 }
 0x1c2   :  { %4785 = vst [vmem:[#allocation77_spill] sm:$0xff] %v3170_v3  ;;  %v664_v36 = vmax.f32 %v662_v18, %v663_v39  ;;  %v3174_v8 = vpop.f32.mrb[51].mxu1 }
 0x1c3   :  { %4784 = vst [vmem:[#allocation76_spill] sm:$0xff] %v3168_v15  ;;  %4786 = vst [vmem:[#allocation78_spill] sm:$0xff] %v3174_v8  ;;  %v701_v48 = vmax.f32 %v699_v20, %v700_v2 }
 0x1c4   :  { %v665_v10 = vrot.slane %v664_v36, 1 }
 0x1c5   :  { %v702_v19 = vrot.slane %v701_v48, 1 }
 0x1c6   :  { %v3178_v62 = vmax.f32 %v664_v36, %v665_v10 }
 0x1c7   :  { %v3180_v35 = vmax.f32 %v701_v48, %v702_v19  ;;  %v3182_v38 = vpop.f32.mrb[52].mxu1 }
 0x1c8   :  { %4787 = vst [vmem:[#allocation79_spill] sm:$0xff] %v3182_v38  ;;  %v778_v18 = vsub.f32 %v2824_v43, %v3178_v62  ;;  %v780_v39 = vsub.f32 %v2828_v45, %v3178_v62  ;;  %v782_v20 = vsub.f32 %v2836_v49, %v3178_v62  ;;  %v784_v2 = vsub.f32 %v2842_v53, %v3178_v62  ;;  %v3192_v0 = vpop.f32.mrb[53].mxu1 }
 0x1c9   :  { %4788 = vst [vmem:[#allocation80_spill] sm:$0xff] %v3192_v0  ;;  %v786_v36 = vsub.f32 %v2848_v57, %v3178_v62  ;;  %v788_v48 = vsub.f32 %v2854_v61, %v3178_v62  ;;  %v790_v43 = vsub.f32 %v2860_v1, %v3178_v62  ;;  %v792_v45 = vsub.f32 %v2866_v7, %v3178_v62  ;;  %v3202_v10 = vpop.f32.mrb[54].mxu1 }
 0x1ca   :  { %4789 = vst [vmem:[#allocation81_spill] sm:$0xff] %v3202_v10  ;;  %v794_v49 = vsub.f32 %v2872_v11, %v3178_v62  ;;  %v796_v53 = vsub.f32 %v2882_v17, %v3178_v62  ;;  %v798_v57 = vsub.f32 %v2896_v25, %v3178_v62  ;;  %v800_v61 = vsub.f32 %v2908_v33, %v3178_v62  ;;  %v3212_v19 = vpop.f32.mrb[55].mxu1 }
 0x1cb   :  { %4790 = vst [vmem:[#allocation82_spill] sm:$0xff] %v3212_v19  ;;  %v802_v1 = vsub.f32 %v2920_v41, %v3178_v62  ;;  %v804_v7 = vsub.f32 %v2932_v58, %v3178_v62  ;;  %v806_v11 = vsub.f32 %v2944_v13, %v3178_v62  ;;  %v808_v17 = vsub.f32 %v2956_v31, %v3178_v62 }
 0x1cc   :  { %v810_v25 = vsub.f32 %v2968_v54, %v3178_v62  ;;  %v812_v33 = vsub.f32 %v2980_v6, %v3178_v62  ;;  %v814_v24 = vsub.f32 %v2992_v5, %v3178_v62  ;;  %v816_v41 = vsub.f32 %v3004_v30, %v3178_v62 }
 0x1cd   :  { %v818_v58 = vsub.f32 %v3016_v46, %v3178_v62  ;;  %v820_v13 = vsub.f32 %v3028_v56, %v3178_v62  ;;  %v822_v31 = vsub.f32 %v3040_v16, %v3178_v62  ;;  %v824_v54 = vsub.f32 %v3052_v42, %v3178_v62 }
 0x1ce   :  { %v826_v6 = vsub.f32 %v3064_v26, %v3178_v62  ;;  %v906_v5 = vmul.f32 1.442695, %v778_v18  ;;  %v910_v19 = vmul.f32 1.442695, %v780_v39  ;;  %v914_v30 = vmul.f32 1.442695, %v782_v20 }
 0x1cf   :  { %v3254_v28 = vpop.f32.mrb[56].mxu1  ;;  %v918_v10 = vmul.f32 1.442695, %v784_v2  ;;  %v922_v16 = vmul.f32 1.442695, %v786_v36 }
 0x1d0   :  { %4791 = vst [vmem:[#allocation83_spill] sm:$0xff] %v3254_v28  ;;  %2391 = vpow2.f32 %v906_v5  ;;  %v926_v8 = vmul.f32 1.442695, %v788_v48  ;;  %v930_v42 = vmul.f32 1.442695, %v790_v43 }
 0x1d1   :  { %2393 = vpow2.f32 %v910_v19  ;;  %v934_v15 = vmul.f32 1.442695, %v792_v45  ;;  %v938_v26 = vmul.f32 1.442695, %v794_v49  ;;  %v942_v28 = vmul.f32 1.442695, %v796_v53 }
 0x1d2   :  { %2395 = vpow2.f32 %v914_v30  ;;  %v946_v18 = vmul.f32 1.442695, %v798_v57  ;;  %v950_v39 = vmul.f32 1.442695, %v800_v61  ;;  %v954_v20 = vmul.f32 1.442695, %v802_v1 }
 0x1d3   :  { %2397 = vpow2.f32 %v918_v10  ;;  %v958_v0 = vmul.f32 1.442695, %v804_v7  ;;  %v962_v2 = vmul.f32 1.442695, %v806_v11  ;;  %v966_v46 = vmul.f32 1.442695, %v808_v17 }
 0x1d4   :  { %2399 = vpow2.f32 %v922_v16  ;;  %v970_v3 = vmul.f32 1.442695, %v810_v25  ;;  %v974_v5 = vmul.f32 1.442695, %v812_v33  ;;  %v978_v36 = vmul.f32 1.442695, %v814_v24 }
 0x1d5   :  { %2401 = vpow2.f32 %v926_v8  ;;  %v3260_v19 = vmul.f32 1.442695, %v816_v41  ;;  %v3262_v48 = vmul.f32 1.442695, %v818_v58  ;;  %v3264_v43 = vmul.f32 1.442695, %v820_v13 }
 0x1d6   :  { %2403 = vpow2.f32 %v930_v42  ;;  %v3266_v45 = vmul.f32 1.442695, %v822_v31  ;;  %v3268_v10 = vmul.f32 1.442695, %v824_v54  ;;  %v3270_v49 = vmul.f32 1.442695, %v826_v6 }
 0x1d7   :  { %2405 = vpow2.f32 %v934_v15  ;;  %v3274_v53 = vpop.f32.mrb[57].mxu1  ;;  %v4796_v30 = vld [vmem:[#allocation18_spill] sm:$0xff]  ;;  %v4800_v58 = vld [vmem:[#allocation24_spill] sm:$0xff]  ;;  %v4801_v41 = vld [vmem:[#allocation27_spill] sm:$0xff] }
 0x1d8   :  { %2407 = vpow2.f32 %v938_v26  ;;  %4792 = vst [vmem:[#allocation84_spill] sm:$0xff] %v3274_v53  ;;  %v3282_v61 = vpop.f32.mrb[58].mxu1  ;;  %v4806_v33 = vld [vmem:[#allocation36_spill] sm:$0xff]  ;;  %v4807_v15 = vld [vmem:[#allocation39_spill] sm:$0xff]  ;;  %v4809_v57 = vld [vmem:[#allocation45_spill] sm:$0xff] }
 0x1d9   :  { %2409 = vpow2.f32 %v942_v28  ;;  %4793 = vst [vmem:[#allocation85_spill] sm:$0xff] %v3282_v61  ;;  %v3292_v17 = vpop.f32.mrb[59].mxu1  ;;  %v4803_v28 = vld [vmem:[#allocation30_spill] sm:$0xff] }
 0x1da   :  { %v3284_v1 = vpop.eup %2391  ;;  %2411 = vpow2.f32 %v946_v18  ;;  %4794 = vst [vmem:[#allocation86_spill] sm:$0xff] %v3292_v17  ;;  %v3302_v13 = vpop.f32.mrb[60].mxu1  ;;  %v4799_v18 = vld [vmem:[#allocation21_spill] sm:$0xff] }
 0x1db   :  { %v3294_v25 = vpop.eup %2393  ;;  %2413 = vpow2.f32 %v950_v39  ;;  %4795 = vst [vmem:[#allocation87_spill] sm:$0xff] %v3302_v13  ;;  %v3312_v42 = vpop.f32.mrb[61].mxu1  ;;  %v4812_v13 = vld [vmem:[#allocation54_spill] sm:$0xff] }
 0x1dc   :  { %v3304_v31 = vpop.eup %2395  ;;  %2415 = vpow2.f32 %v954_v20  ;;  %v1162_v54 = vadd.f32 %v3294_v25, %v3284_v1  ;;  %4797 = vst [vmem:[#allocation18_spill] sm:$0xff] %v3312_v42  ;;  %v3322_v11 = vpop.f32.mrb[62].mxu1  ;;  %v4811_v20 = vld [vmem:[#allocation51_spill] sm:$0xff] }
 0x1dd   :  { %v3314_v26 = vpop.eup %2397  ;;  %2417 = vpow2.f32 %v958_v0  ;;  %4802 = vst [vmem:[#allocation21_spill] sm:$0xff] %v3322_v11  ;;  %v4804_v0 = vld [vmem:[#allocation33_spill] sm:$0xff]  ;;  %v3331_v39 = vpop.f32.mrb[63].mxu1  ;;  %v4810_v11 = vld [vmem:[#allocation48_spill] sm:$0xff] }
 0x1de   :  { %4798 = vst [vmem:[#allocation88_spill] sm:$0xff] %v3314_v26  ;;  %v3324_v6 = vpop.eup %2399  ;;  %2419 = vpow2.f32 %v962_v2  ;;  %v1163_v16 = vadd.f32 %v3304_v31, %v1162_v54  ;;  %4805 = vst [vmem:[#allocation24_spill] sm:$0xff] %v3331_v39  ;;  %v4808_v2 = vld [vmem:[#allocation42_spill] sm:$0xff]  ;;  %v4814_v39 = vld [vmem:[#allocation60_spill] sm:$0xff] }
 0x1df   :  { %v3333_v24 = vpop.eup %2401  ;;  %2421 = vpow2.f32 %v966_v46 }
 0x1e0   :  { %v3341_v56 = vpop.eup %2403  ;;  %2423 = vpow2.f32 %v970_v3  ;;  %v1164_v7 = vadd.f32 %v3314_v26, %v1163_v16  ;;  %v4817_v3 = vld [vmem:[#allocation69_spill] sm:$0xff] }
 0x1e1   :  { %v3348_v42 = vpop.eup %2405  ;;  %2425 = vpow2.f32 %v974_v5  ;;  %v4818_v5 = vsub.f32 %v3076_v12, %v3178_v62  ;;  %v4822_v12 = vsub.f32 %v3124_v22, %v3178_v62  ;;  %v4827_v22 = vsub.f32 %v2826_v44, %v3180_v35 }
 0x1e2   :  { %v3356_v61 = vpop.eup %2407  ;;  %2427 = vpow2.f32 %v978_v36  ;;  %v1165_v16 = vadd.f32 %v3324_v6, %v1164_v7  ;;  %v4820_v36 = vsub.f32 %v3100_v32, %v3178_v62  ;;  %v4825_v32 = vsub.f32 %v3148_v40, %v3178_v62 }
 0x1e3   :  { %v3363_v26 = vpop.eup %2409  ;;  %2429 = vpow2.f32 %v3260_v19  ;;  %v1006_v46 = vmul.f32 1.442695, %v4818_v5  ;;  %v4819_v19 = vsub.f32 %v3088_v60, %v3178_v62  ;;  %v1022_v5 = vmul.f32 1.442695, %v4822_v12 }
 0x1e4   :  { %v3372_v7 = vpop.eup %2411  ;;  %2431 = vpow2.f32 %v3262_v48  ;;  %v1166_v8 = vadd.f32 %v3333_v24, %v1165_v16  ;;  %v1014_v17 = vmul.f32 1.442695, %v4820_v36  ;;  %v4821_v48 = vsub.f32 %v3112_v27, %v3178_v62 }
 0x1e5   :  { %v1010_v53 = vmul.f32 1.442695, %v4819_v19  ;;  %v3382_v54 = vpop.eup %2413  ;;  %2433 = vpow2.f32 %v3264_v43  ;;  %v4824_v16 = vsub.f32 %v3136_v52, %v3178_v62  ;;  %v1030_v36 = vmul.f32 1.442695, %v4825_v32 }
 0x1e6   :  { %v1018_v34 = vmul.f32 1.442695, %v4821_v48  ;;  %v3394_v60 = vpop.eup %2415  ;;  %2435 = vpow2.f32 %v3266_v45  ;;  %v1167_v19 = vadd.f32 %v3341_v56, %v1166_v8  ;;  %v908_v48 = vmul.f32 1.442695, %v4827_v22 }
 0x1e7   :  { %4823 = vst [vmem:[#allocation27_spill] sm:$0xff] %v3394_v60  ;;  %v1026_v43 = vmul.f32 1.442695, %v4824_v16  ;;  %v3404_v27 = vpop.eup %2417  ;;  %2437 = vpow2.f32 %v3268_v10  ;;  %v4828_v45 = vsub.f32 %v2832_v47, %v3180_v35  ;;  %v4829_v52 = vsub.f32 %v2839_v51, %v3180_v35 }
 0x1e8   :  { %4826 = vst [vmem:[#allocation30_spill] sm:$0xff] %v3404_v27  ;;  %v3416_v40 = vpop.eup %2419  ;;  %2439 = vpow2.f32 %v3270_v49  ;;  %v1168_v62 = vadd.f32 %v3348_v42, %v1167_v19  ;;  %v4831_v10 = vsub.f32 %v2845_v55, %v3180_v35  ;;  %v4832_v44 = vsub.f32 %v2851_v59, %v3180_v35 }
 0x1e9   :  { %v912_v12 = vmul.f32 1.442695, %v4828_v45  ;;  %v916_v16 = vmul.f32 1.442695, %v4829_v52  ;;  %4830 = vst [vmem:[#allocation33_spill] sm:$0xff] %v3416_v40  ;;  %v3426_v47 = vpop.eup %2421  ;;  %2441 = vpow2.f32 %v1006_v46  ;;  %v4834_v51 = vsub.f32 %v2857_v63, %v3180_v35 }
 0x1ea   :  { %v920_v8 = vmul.f32 1.442695, %v4831_v10  ;;  %v924_v32 = vmul.f32 1.442695, %v4832_v44  ;;  %4833 = vst [vmem:[#allocation36_spill] sm:$0xff] %v3426_v47  ;;  %v4835_v49 = vsub.f32 %v2863_v4, %v3180_v35  ;;  %v4836_v55 = vsub.f32 %v2869_v9, %v3180_v35  ;;  %v3441_v52 = vpop.eup %2423 }
 0x1eb   :  { %v928_v22 = vmul.f32 1.442695, %v4834_v51  ;;  %4837 = vst [vmem:[#allocation39_spill] sm:$0xff] %v3441_v52  ;;  %2443 = vpow2.f32 %v1010_v53  ;;  %v1169_v59 = vadd.f32 %v3356_v61, %v1168_v62  ;;  %v4838_v46 = vsub.f32 %v2877_v14, %v3180_v35  ;;  %v3454_v44 = vpop.eup %2425 }
 0x1ec   :  { %v3434_v45 = vmul.f32 1.442695, %v4835_v49  ;;  %v3439_v19 = vmul.f32 1.442695, %v4836_v55  ;;  %v4839_v4 = vsub.f32 %v2889_v21, %v3180_v35  ;;  %4840 = vst [vmem:[#allocation42_spill] sm:$0xff] %v3454_v44  ;;  %2445 = vpow2.f32 %v1014_v17  ;;  %v3471_v21 = vpop.eup %2427 }
 0x1ed   :  { %v3447_v63 = vmul.f32 1.442695, %v4838_v46  ;;  %v4841_v9 = vsub.f32 %v2902_v29, %v3180_v35  ;;  %v4842_v53 = vsub.f32 %v2914_v37, %v3180_v35  ;;  %v4843_v14 = vsub.f32 %v2926_v50, %v3180_v35  ;;  %4844 = vst [vmem:[#allocation45_spill] sm:$0xff] %v3471_v21 }
 0x1ee   :  { %v3452_v10 = vmul.f32 1.442695, %v4839_v4  ;;  %2447 = vpow2.f32 %v1018_v34  ;;  %v1170_v17 = vadd.f32 %v3363_v26, %v1169_v59  ;;  %v4845_v29 = vsub.f32 %v4796_v30, %v3180_v35  ;;  %v3484_v4 = vpop.eup %2429 }
 0x1ef   :  { %v3459_v51 = vmul.f32 1.442695, %v4841_v9  ;;  %v3464_v62 = vmul.f32 1.442695, %v4842_v53  ;;  %v3469_v49 = vmul.f32 1.442695, %v4843_v14  ;;  %v4846_v37 = vsub.f32 %v4799_v18, %v3180_v35  ;;  %v3501_v18 = vpop.eup %2431 }
 0x1f0   :  { %v3477_v55 = vmul.f32 1.442695, %v4845_v29  ;;  %4847 = vst [vmem:[#allocation48_spill] sm:$0xff] %v3484_v4  ;;  %2449 = vpow2.f32 %v1022_v5  ;;  %v4848_v50 = vsub.f32 %v4800_v58, %v3180_v35  ;;  %v4849_v34 = vsub.f32 %v4801_v41, %v3180_v35  ;;  %4851 = vst [vmem:[#allocation51_spill] sm:$0xff] %v3501_v18 }
 0x1f1   :  { %v3482_v46 = vmul.f32 1.442695, %v4846_v37  ;;  %v4850_v30 = vsub.f32 %v4803_v28, %v3180_v35  ;;  %2451 = vpow2.f32 %v1026_v43  ;;  %v1171_v5 = vadd.f32 %v3372_v7, %v1170_v17  ;;  %v3514_v37 = vpop.eup %2433 }
 0x1f2   :  { %v3489_v9 = vmul.f32 1.442695, %v4848_v50  ;;  %v3494_v59 = vmul.f32 1.442695, %v4849_v34  ;;  %v4852_v58 = vsub.f32 %v4804_v0, %v3180_v35  ;;  %v4853_v41 = vsub.f32 %v4806_v33, %v3180_v35  ;;  %4854 = vst [vmem:[#allocation54_spill] sm:$0xff] %v3514_v37  ;;  %v3531_v33 = vpop.eup %2435 }
 0x1f3   :  { %v3499_v53 = vmul.f32 1.442695, %v4850_v30  ;;  %2453 = vpow2.f32 %v1030_v36  ;;  %v4855_v28 = vsub.f32 %v4807_v15, %v3180_v35  ;;  %v4856_v43 = vsub.f32 %v4808_v2, %v3180_v35  ;;  %4859 = vst [vmem:[#allocation69_spill] sm:$0xff] %v3531_v33 }
 0x1f4   :  { %v3507_v14 = vmul.f32 1.442695, %v4852_v58  ;;  %v3512_v29 = vmul.f32 1.442695, %v4853_v41  ;;  %v4857_v0 = vsub.f32 %v4809_v57, %v3180_v35  ;;  %v1172_v30 = vadd.f32 %v3382_v54, %v1171_v5  ;;  %v3544_v41 = vpop.eup %2437  ;;  %v4864_v57 = vld [vmem:[#allocation77_spill] sm:$0xff]  ;;  %v4866_v5 = vld [vmem:[#allocation80_spill] sm:$0xff] }
 0x1f5   :  { %v3519_v50 = vmul.f32 1.442695, %v4855_v28  ;;  %v3524_v17 = vmul.f32 1.442695, %v4856_v43  ;;  %2455 = vpow2.f32 %v908_v48  ;;  %v4860_v15 = vsub.f32 %v4810_v11, %v3180_v35  ;;  %4863 = vst [vmem:[#allocation90_spill] sm:$0xff] %v3544_v41  ;;  %v4867_v48 = vld [vmem:[#allocation76_spill] sm:$0xff] }
 0x1f6   :  { %v3529_v34 = vmul.f32 1.442695, %v4857_v0  ;;  %v4862_v2 = vsub.f32 %v4811_v20, %v3180_v35  ;;  %2457 = vpow2.f32 %v912_v12  ;;  %v4865_v28 = vmax.f32 %v3163_v23, %v4864_v57  ;;  %v4868_v0 = vld [vmem:[#allocation78_spill] sm:$0xff]  ;;  %v4871_v12 = vld [vmem:[#allocation88_spill] sm:$0xff] }
 0x1f7   :  { %v3537_v36 = vmul.f32 1.442695, %v4860_v15  ;;  %v1173_v20 = vadd.f32 %v3394_v60, %v1172_v30  ;;  %2459 = vpow2.f32 %v916_v16  ;;  %v4882_v30 = vld [vmem:[#allocation86_spill] sm:$0xff] }
 0x1f8   :  { %4858 = vst [vmem:[#allocation60_spill] sm:$0xff] %v3529_v34  ;;  %v3542_v58 = vmul.f32 1.442695, %v4862_v2  ;;  %v729_v43 = vmax.f32 %v4865_v28, %v3182_v38  ;;  %v4869_v34 = vmax.f32 %v4867_v48, %v4868_v0  ;;  %2461 = vpow2.f32 %v920_v8  ;;  %v4873_v38 = vld [vmem:[#allocation81_spill] sm:$0xff]  ;;  %v4877_v8 = vld [vmem:[#allocation83_spill] sm:$0xff] }
 0x1f9   :  { %4861 = vst [vmem:[#allocation89_spill] sm:$0xff] %v3537_v36  ;;  %v3556_v36 = vpop.eup %2439  ;;  %v1174_v16 = vadd.f32 %v3404_v27, %v1173_v20  ;;  %2463 = vpow2.f32 %v924_v32 }
 0x1fa   :  { %v766_v11 = vmax.f32 %v4869_v34, %v4866_v5  ;;  %4870 = vst [vmem:[#allocation77_spill] sm:$0xff] %v3556_v36  ;;  %v3563_v28 = vpop.eup %2441  ;;  %v730_v48 = vmax.f32 %v729_v43, %v4873_v38  ;;  %v4874_v34 = vld [vmem:[#allocation82_spill] sm:$0xff]  ;;  %2465 = vpow2.f32 %v928_v22 }
 0x1fb   :  { %4872 = vst [vmem:[#allocation76_spill] sm:$0xff] %v3563_v28  ;;  %v3569_v0 = vpop.eup %2443  ;;  %v1175_v32 = vadd.f32 %v3416_v40, %v1174_v16  ;;  %2467 = vpow2.f32 %v3434_v45  ;;  %v4886_v40 = vld [vmem:[#allocation18_spill] sm:$0xff] }
 0x1fc   :  { %v767_v5 = vmax.f32 %v766_v11, %v4874_v34  ;;  %4875 = vst [vmem:[#allocation88_spill] sm:$0xff] %v3569_v0  ;;  %v3576_v2 = vpop.eup %2445  ;;  %v731_v43 = vmax.f32 %v730_v48, %v4877_v8  ;;  %v4878_v11 = vld [vmem:[#allocation84_spill] sm:$0xff]  ;;  %2469 = vpow2.f32 %v3439_v19 }
 0x1fd   :  { %4876 = vst [vmem:[#allocation91_spill] sm:$0xff] %v3576_v2  ;;  %v3582_v38 = vpop.eup %2447  ;;  %v1176_v45 = vadd.f32 %v3426_v47, %v1175_v32  ;;  %2471 = vpow2.f32 %v3447_v63 }
 0x1fe   :  { %v768_v34 = vmax.f32 %v767_v5, %v4878_v11  ;;  %4879 = vst [vmem:[#allocation83_spill] sm:$0xff] %v3582_v38  ;;  %v3590_v22 = vpop.eup %2449  ;;  %v4881_v5 = vld [vmem:[#allocation85_spill] sm:$0xff]  ;;  %2473 = vpow2.f32 %v3452_v10 }
 0x1ff   :  { %4880 = vst [vmem:[#allocation92_spill] sm:$0xff] %v3590_v22  ;;  %v732_v48 = vmax.f32 %v731_v43, %v4881_v5  ;;  %v3597_v16 = vpop.eup %2451  ;;  %v1177_v63 = vadd.f32 %v3441_v52, %v1176_v45  ;;  %2475 = vpow2.f32 %v3459_v51  ;;  %v4887_v10 = vld [vmem:[#allocation21_spill] sm:$0xff] }
 0x200   :  { %v769_v15 = vmax.f32 %v768_v34, %v4882_v30  ;;  %4883 = vst [vmem:[#allocation85_spill] sm:$0xff] %v3597_v16  ;;  %v3605_v19 = vpop.eup %2453  ;;  %v4885_v34 = vld [vmem:[#allocation87_spill] sm:$0xff]  ;;  %2477 = vpow2.f32 %v3464_v62  ;;  %v4889_v62 = vsub.f32 %v4812_v13, %v3180_v35 }
 0x201   :  { %4884 = vst [vmem:[#allocation93_spill] sm:$0xff] %v3605_v19  ;;  %v733_v43 = vmax.f32 %v732_v48, %v4885_v34  ;;  %v2456_v32 = vpop.eup %2455  ;;  %v1178_v45 = vadd.f32 %v3454_v44, %v1177_v63  ;;  %2479 = vpow2.f32 %v3469_v49  ;;  %v4892_v19 = vpack.c.bf16 %v3294_v25, %v3284_v1 }
 0x202   :  { %v770_v11 = vmax.f32 %v769_v15, %v4886_v40  ;;  %v2458_v47 = vpop.eup %2457  ;;  %v4888_v15 = vld [vmem:[#allocation24_spill] sm:$0xff]  ;;  %2481 = vpow2.f32 %v3477_v55  ;;  %v3629_v20 = vmul.f32 1.442695, %v4889_v62 }
 0x203   :  { %v734_v48 = vmax.f32 %v733_v43, %v4887_v10  ;;  %v2460_v60 = vpop.eup %2459  ;;  %v1199_v51 = vadd.f32 %v2458_v47, %v2456_v32  ;;  %v1311_v23 = vpack.c.bf16 %v2458_v47, %v2456_v32  ;;  %v1179_v30 = vadd.f32 %v3471_v21, %v1178_v45  ;;  %v4890_v47 = vld [vmem:[#allocation57_spill] sm:$0xff] }
 0x204   :  { %v771_v40 = vmax.f32 %v770_v11, %v4888_v15  ;;  %v2462_v52 = vpop.eup %2461  ;;  %2483 = vpow2.f32 %v3482_v46  ;;  %v4891_v55 = vsub.f32 %v4890_v47, %v3180_v35 }
 0x205   :  { %v735_v43 = vrot.slane %v734_v48, 4  ;;  %v2464_v15 = vpop.eup %2463  ;;  %v1200_v63 = vadd.f32 %v2460_v60, %v1199_v51  ;;  %1378 = vmatprep.subr.bf16.mxu0 %v1311_v23  ;;  %v1313_v49 = vpack.c.bf16 %v2462_v52, %v2460_v60  ;;  %2485 = vpow2.f32 %v3489_v9 }
 0x206   :  { %v772_v11 = vrot.slane %v771_v40, 4  ;;  %v2466_v44 = vpop.eup %2465  ;;  %v1012_v32 = vmul.f32 1.442695, %v4891_v55  ;;  %1379 = vmatpush1.bf16.msra.mxu0 %v4892_v19  ;;  %v1180_v45 = vadd.f32 %v3484_v4, %v1179_v30  ;;  %2487 = vpow2.f32 %v3494_v59  ;;  %v4897_v55 = vld [vmem:[#allocation66_spill] sm:$0xff] }
 0x207   :  { %v736_v13 = vmax.f32 %v734_v48, %v735_v43  ;;  %v2468_v27 = vpop.eup %2467  ;;  %v1201_v46 = vadd.f32 %v2462_v52, %v1200_v63  ;;  %1380 = vmatprep.subr.bf16.mxu0 %v1313_v49  ;;  %v1315_v60 = vpack.c.bf16 %v2466_v44, %v2464_v15  ;;  %2489 = vpow2.f32 %v3499_v53  ;;  %v4894_v52 = vld [vmem:[#allocation63_spill] sm:$0xff] }
 0x208   :  { %v773_v62 = vmax.f32 %v771_v40, %v772_v11  ;;  %v2470_v23 = vpop.eup %2469  ;;  %v4893_v9 = vsub.f32 %v4814_v39, %v3180_v35  ;;  %v1181_v1 = vadd.f32 %v3501_v18, %v1180_v45  ;;  %2491 = vpow2.f32 %v3507_v14 }
 0x209   :  { %v737_v40 = vrot.slane %v736_v13, 2  ;;  %v2472_v43 = vpop.eup %2471  ;;  %v1202_v25 = vadd.f32 %v2464_v15, %v1201_v46  ;;  %v1317_v30 = vpack.c.bf16 %v2470_v23, %v2468_v27  ;;  %2493 = vpow2.f32 %v3512_v29 }
 0x20a   :  { %v1016_v48 = vmul.f32 1.442695, %v4893_v9  ;;  %v774_v51 = vrot.slane %v773_v62, 2  ;;  %v2474_v59 = vpop.eup %2473  ;;  %v4895_v19 = vsub.f32 %v4894_v52, %v3180_v35  ;;  %v4896_v39 = vpack.c.bf16 %v4871_v12, %v3304_v31 }
 0x20b   :  { %v738_v11 = vmax.f32 %v736_v13, %v737_v40  ;;  %v3657_v49 = vpop.eup %2475  ;;  %v1182_v14 = vadd.f32 %v3514_v37, %v1181_v1  ;;  %2495 = vpow2.f32 %v3519_v50  ;;  %v1203_v15 = vadd.f32 %v2466_v44, %v1202_v25  ;;  %v4900_v44 = vld [vmem:[#allocation60_spill] sm:$0xff]  ;;  %v4901_v40 = vld [vmem:[#allocation89_spill] sm:$0xff] }
 0x20c   :  { %v1020_v53 = vmul.f32 1.442695, %v4895_v19  ;;  %v3652_v63 = vmax.f32 %v773_v62, %v774_v51  ;;  %1381 = vmatpush1.bf16.msra.mxu0 %v4896_v39  ;;  %v1319_v29 = vpack.c.bf16 %v2474_v59, %v2472_v43  ;;  %v3661_v47 = vpop.eup %2477  ;;  %2497 = vpow2.f32 %v3524_v17  ;;  %v4902_v51 = vld [vmem:[#allocation72_spill] sm:$0xff] }
 0x20d   :  { %1382 = vmatprep.subr.bf16.mxu0 %v1315_v60  ;;  %v4898_v13 = vsub.f32 %v4897_v55, %v3180_v35  ;;  %v4899_v31 = vsub.f32 %v4817_v3, %v3180_v35  ;;  %v739_v45 = vrot.slane %v738_v11, 1  ;;  %v3670_v46 = vpop.eup %2479  ;;  %v1183_v50 = vadd.f32 %v3531_v33, %v1182_v14  ;;  %v4939_v33 = vld [vmem:[#allocation74_spill] sm:$0xff] }
 0x20e   :  { %2499 = vpow2.f32 %v4900_v44  ;;  %v1204_v60 = vadd.f32 %v2468_v27, %v1203_v15  ;;  %v1321_v9 = vpack.c.bf16 %v3661_v47, %v3657_v49  ;;  %v3676_v17 = vpop.eup %2481  ;;  %v4903_v1 = vsub.f32 %v4902_v51, %v3180_v35  ;;  %v4916_v51 = vld [vmem:[#allocation26_spill] sm:$0xff] }
 0x20f   :  { %v1024_v62 = vmul.f32 1.442695, %v4898_v13  ;;  %v1028_v12 = vmul.f32 1.442695, %v4899_v31  ;;  %2501 = vpow2.f32 %v4901_v40  ;;  %v3682_v25 = vmax.f32 %v738_v11, %v739_v45  ;;  %v3688_v27 = vpop.eup %2483  ;;  %v4905_v11 = vld [vmem:[#allocation7_spill] sm:$0xff]  ;;  %v4910_v40 = vld [vmem:[#allocation17_spill] sm:$0xff] }
 0x210   :  { %v1032_v3 = vmul.f32 1.442695, %v4903_v1  ;;  %v4904_v19 = vpack.c.bf16 %v3333_v24, %v3324_v6  ;;  %v1184_v39 = vadd.f32 %v3544_v41, %v1183_v50  ;;  %2503 = vpow2.f32 %v3542_v58  ;;  %v3694_v15 = vpop.eup %2485  ;;  %v4906_v24 = vld [vmem:[#allocation9_spill] sm:$0xff]  ;;  %v4907_v13 = vld [vmem:[#allocation11_spill] sm:$0xff]  ;;  %v4911_v1 = vld [vmem:[#allocation20_spill] sm:$0xff] }
 0x211   :  { %v1205_v14 = vadd.f32 %v2470_v23, %v1204_v60  ;;  %2505 = vpow2.f32 %v3629_v20  ;;  %v3703_v45 = vpop.eup %2487  ;;  %v4909_v20 = vld [vmem:[#allocation15_spill] sm:$0xff]  ;;  %v4917_v50 = vld [vmem:[#allocation29_spill] sm:$0xff]  ;;  %v4944_v41 = vpack.c.bf16 %v3676_v17, %v3670_v46 }
 0x212   :  { %1383 = vmatpush1.bf16.msra.mxu0 %v4904_v19  ;;  %v1185_v58 = vadd.f32 %v3556_v36, %v1184_v39  ;;  %2507 = vpow2.f32 %v1012_v32  ;;  %v3708_v44 = vpop.eup %2489  ;;  %v4912_v39 = vpack.c.bf16 %v3348_v42, %v3341_v56  ;;  %v4918_v42 = vld [vmem:[#allocation32_spill] sm:$0xff]  ;;  %v4923_v56 = vld [vmem:[#allocation41_spill] sm:$0xff]  ;;  %v4928_v19 = vld [vmem:[#allocation50_spill] sm:$0xff] }
 0x213   :  { %1384 = vmatprep.subr.bf16.mxu0 %v1317_v30  ;;  %v1206_v23 = vadd.f32 %v2472_v43, %v1205_v14  ;;  %v4908_v30 = vld [vmem:[#allocation13_spill] sm:$0xff]  ;;  %2509 = vpow2.f32 %v1016_v48  ;;  %v3719_v32 = vpop.eup %2491  ;;  %v4914_v48 = vld [vmem:[#allocation23_spill] sm:$0xff]  ;;  %v874_v55 = vsub.f32 %v4928_v19, %v3682_v25 }
 0x214   :  { %4913 = vst [vmem:[#allocation87_spill] sm:$0xff] %v3719_v32  ;;  %v1186_v43 = vadd.f32 %v3563_v28, %v1185_v58  ;;  %2511 = vpow2.f32 %v1020_v53  ;;  %v3724_v60 = vpop.eup %2493  ;;  %v4930_v6 = vld [vmem:[#allocation53_spill] sm:$0xff] }
 0x215   :  { %v1207_v14 = vadd.f32 %v2474_v59, %v1206_v23  ;;  %4915 = vst [vmem:[#allocation21_spill] sm:$0xff] %v3724_v60  ;;  %2513 = vpow2.f32 %v1024_v62  ;;  %v3732_v31 = vpop.eup %2495  ;;  %v4922_v23 = vld [vmem:[#allocation38_spill] sm:$0xff]  ;;  %v876_v35 = vsub.f32 %v4930_v6, %v3682_v25  ;;  %v4935_v19 = vld [vmem:[#allocation65_spill] sm:$0xff]  ;;  %v4936_v6 = vld [vmem:[#allocation68_spill] sm:$0xff] }
 0x216   :  { %1385 = vmatpush1.bf16.msra.mxu0 %v4912_v39  ;;  %4919 = vst [vmem:[#allocation57_spill] sm:$0xff] %v3732_v31  ;;  %v1187_v59 = vadd.f32 %v3569_v0, %v1186_v43  ;;  %2515 = vpow2.f32 %v1028_v12  ;;  %v3738_v62 = vpop.eup %2497  ;;  %v4924_v39 = vld [vmem:[#allocation44_spill] sm:$0xff]  ;;  %v4925_v12 = vpack.c.bf16 %v3363_v26, %v3356_v61  ;;  %v886_v36 = vsub.f32 %v4936_v6, %v3682_v25 }
 0x217   :  { %1386 = vmatprep.subr.bf16.mxu0 %v1319_v29  ;;  %v1208_v53 = vadd.f32 %v3657_v49, %v1207_v14  ;;  %v4920_v29 = vld [vmem:[#allocation35_spill] sm:$0xff]  ;;  %4921 = vst [vmem:[#allocation63_spill] sm:$0xff] %v3738_v62  ;;  %2517 = vpow2.f32 %v1032_v3  ;;  %v4931_v61 = vld [vmem:[#allocation56_spill] sm:$0xff] }
 0x218   :  { %v3749_v49 = vpop.eup %2499  ;;  %v1188_v43 = vadd.f32 %v3576_v2, %v1187_v59  ;;  %v4927_v3 = vld [vmem:[#allocation47_spill] sm:$0xff]  ;;  %v878_v26 = vsub.f32 %v4931_v61, %v3682_v25  ;;  %v884_v2 = vsub.f32 %v4935_v19, %v3682_v25  ;;  %v4941_v19 = vpack.c.bf16 %v3382_v54, %v3372_v7 }
 0x219   :  { %4926 = vst [vmem:[#allocation66_spill] sm:$0xff] %v3749_v49  ;;  %v1209_v14 = vadd.f32 %v3661_v47, %v1208_v53  ;;  %v872_v58 = vsub.f32 %v4927_v3, %v3682_v25  ;;  %v3757_v52 = vpop.eup %2501  ;;  %v4933_v47 = vld [vmem:[#allocation62_spill] sm:$0xff]  ;;  %v4938_v61 = vld [vmem:[#allocation71_spill] sm:$0xff]  ;;  %v890_v53 = vsub.f32 %v4939_v33, %v3682_v25  ;;  %v898_v33 = vsub.f32 %v4877_v8, %v3682_v25 }
 0x21a   :  { %1387 = vmatpush1.bf16.msra.mxu0 %v4925_v12  ;;  %4929 = vst [vmem:[#allocation60_spill] sm:$0xff] %v3757_v52  ;;  %v4932_v12 = vld [vmem:[#allocation59_spill] sm:$0xff]  ;;  %v3767_v0 = vpop.eup %2503  ;;  %v1189_v3 = vadd.f32 %v3582_v38, %v1188_v43  ;;  %v900_v54 = vsub.f32 %v4881_v5, %v3682_v25  ;;  %v902_v7 = vsub.f32 %v4885_v34, %v3682_v25 }
 0x21b   :  { %1388 = vmatprep.subr.bf16.mxu0 %v1321_v9  ;;  %v880_v59 = vsub.f32 %v4932_v12, %v3682_v25  ;;  %4934 = vst [vmem:[#allocation89_spill] sm:$0xff] %v3767_v0  ;;  %v1210_v9 = vadd.f32 %v3670_v46, %v1209_v14  ;;  %v3775_v28 = vpop.eup %2505  ;;  %v888_v12 = vsub.f32 %v4938_v61, %v3682_v25  ;;  %v4940_v43 = vld [vmem:[#allocation79_spill] sm:$0xff]  ;;  %v4943_v61 = vld [vmem:[#allocation81_spill] sm:$0xff] }
 0x21c   :  { %4937 = vst [vmem:[#allocation72_spill] sm:$0xff] %v3775_v28  ;;  %v3788_v38 = vpop.eup %2507  ;;  %v1190_v6 = vadd.f32 %v3590_v22, %v1189_v3  ;;  %v896_v37 = vsub.f32 %v4943_v61, %v3682_v25  ;;  %v904_v3 = vsub.f32 %v4887_v10, %v3682_v25  ;;  %v4949_v34 = vsub.f32 %v4907_v13, %v3682_v25 }
 0x21d   :  { %4942 = vst [vmem:[#allocation7_spill] sm:$0xff] %v3788_v38  ;;  %v1211_v18 = vadd.f32 %v3676_v17, %v1210_v9  ;;  %v3799_v14 = vpop.eup %2509  ;;  %v4946_v9 = vsub.f32 %v4905_v11, %v3682_v25  ;;  %v4948_v17 = vsub.f32 %v4906_v24, %v3682_v25  ;;  %v4951_v10 = vsub.f32 %v4908_v30, %v3682_v25 }
 0x21e   :  { %1389 = vmatpush1.bf16.msra.mxu0 %v4941_v19  ;;  %4945 = vst [vmem:[#allocation9_spill] sm:$0xff] %v3799_v14  ;;  %v3810_v8 = vpop.eup %2511  ;;  %v1191_v46 = vadd.f32 %v3597_v16, %v1190_v6  ;;  %v1042_v61 = vmul.f32 1.442695, %v4949_v34  ;;  %v4952_v6 = vsub.f32 %v4909_v20, %v3682_v25  ;;  %v4954_v16 = vld [vmem:[#allocation27_spill] sm:$0xff]  ;;  %v4958_v30 = vsub.f32 %v4910_v40, %v3682_v25 }
 0x21f   :  { %1390 = vmatprep.subr.bf16.mxu0 %v4944_v41  ;;  %v1034_v19 = vmul.f32 1.442695, %v4946_v9  ;;  %4947 = vst [vmem:[#allocation11_spill] sm:$0xff] %v3810_v8  ;;  %v1212_v41 = vadd.f32 %v3688_v27, %v1211_v18  ;;  %v1038_v5 = vmul.f32 1.442695, %v4948_v17  ;;  %v3820_v22 = vpop.eup %2513  ;;  %v4953_v18 = vld [vmem:[#allocation30_spill] sm:$0xff]  ;;  %v4959_v20 = vsub.f32 %v4911_v1, %v3682_v25 }
 0x220   :  { %4950 = vst [vmem:[#allocation13_spill] sm:$0xff] %v3820_v22  ;;  %v1046_v11 = vmul.f32 1.442695, %v4951_v10  ;;  %v1050_v9 = vmul.f32 1.442695, %v4952_v6  ;;  %v4955_v21 = vpack.c.bf16 %v4953_v18, %v4954_v16  ;;  %v3831_v24 = vpop.eup %2515  ;;  %v4956_v17 = vld [vmem:[#allocation93_spill] sm:$0xff]  ;;  %v4962_v40 = vsub.f32 %v4916_v51, %v3682_v25 }
 0x221   :  { %2519 = vpow2.f32 %v1034_v19  ;;  %v3834_v13 = vadd.f32 %v4956_v17, %v1191_v46  ;;  %v1213_v34 = vadd.f32 %v3694_v15, %v1212_v41  ;;  %v1054_v19 = vmul.f32 1.442695, %v4958_v30  ;;  %v3840_v10 = vpop.eup %2517  ;;  %v4996_v17 = vld [vmem:[#allocation49_spill] sm:$0xff] }
 0x222   :  { %1391 = vmatpush1.bf16.msra.mxu0 %v4955_v21  ;;  %2521 = vpow2.f32 %v1038_v5  ;;  %v1058_v16 = vmul.f32 1.442695, %v4959_v20  ;;  %v4960_v21 = vsub.f32 %v4914_v48, %v3682_v25  ;;  %v4961_v46 = vrot.slane %v3652_v63, 1 }
 0x223   :  { %4957 = vst [vmem:[#allocation15_spill] sm:$0xff] %v3834_v13  ;;  %2523 = vpow2.f32 %v1042_v61  ;;  %v1214_v5 = vadd.f32 %v3703_v45, %v1213_v34  ;;  %v1066_v61 = vmul.f32 1.442695, %v4962_v40  ;;  %v4963_v1 = vsub.f32 %v4917_v50, %v3682_v25  ;;  %v4995_v13 = vld [vmem:[#allocation46_spill] sm:$0xff] }
 0x224   :  { %v1062_v6 = vmul.f32 1.442695, %v4960_v21  ;;  %v3851_v41 = vmax.f32 %v3652_v63, %v4961_v46  ;;  %2525 = vpow2.f32 %v1046_v11  ;;  %v4964_v48 = vsub.f32 %v4918_v42, %v3682_v25 }
 0x225   :  { %v1070_v18 = vmul.f32 1.442695, %v4963_v1  ;;  %2527 = vpow2.f32 %v1050_v9  ;;  %v4965_v63 = vsub.f32 %v4920_v29, %v3682_v25  ;;  %v4966_v11 = vsub.f32 %v4922_v23, %v3682_v25 }
 0x226   :  { %v1074_v30 = vmul.f32 1.442695, %v4964_v48  ;;  %v1215_v51 = vadd.f32 %v3708_v44, %v1214_v5  ;;  %2529 = vpow2.f32 %v1054_v19  ;;  %v4967_v50 = vsub.f32 %v4923_v56, %v3682_v25 }
 0x227   :  { %v1078_v20 = vmul.f32 1.442695, %v4965_v63  ;;  %v1082_v34 = vmul.f32 1.442695, %v4966_v11  ;;  %v4968_v9 = vsub.f32 %v4924_v39, %v3682_v25  ;;  %2531 = vpow2.f32 %v1058_v16 }
 0x228   :  { %v1086_v21 = vmul.f32 1.442695, %v4967_v50  ;;  %v1094_v46 = vmul.f32 1.442695, %v872_v58  ;;  %v1098_v40 = vmul.f32 1.442695, %v874_v55  ;;  %v1216_v1 = vadd.f32 %v3719_v32, %v1215_v51 }
 0x229   :  { %v1090_v42 = vmul.f32 1.442695, %v4968_v9  ;;  %v1102_v29 = vmul.f32 1.442695, %v876_v35  ;;  %2533 = vpow2.f32 %v1062_v6  ;;  %v1106_v23 = vmul.f32 1.442695, %v878_v26 }
 0x22a   :  { %v1110_v48 = vmul.f32 1.442695, %v880_v59  ;;  %2535 = vpow2.f32 %v1066_v61  ;;  %v4969_v19 = vsub.f32 %v4933_v47, %v3682_v25  ;;  %v3880_v56 = vmul.f32 1.442695, %v884_v2  ;;  %v4979_v51 = vld [vmem:[#allocation14_spill] sm:$0xff]  ;;  %v4985_v50 = vld [vmem:[#allocation25_spill] sm:$0xff] }
 0x22b   :  { %v3882_v63 = vmul.f32 1.442695, %v886_v36  ;;  %v1217_v39 = vadd.f32 %v3724_v60, %v1216_v1  ;;  %2537 = vpow2.f32 %v1070_v18  ;;  %v3885_v58 = vmul.f32 1.442695, %v888_v12  ;;  %v3889_v55 = vpop.eup %2519  ;;  %v4981_v1 = vld [vmem:[#allocation16_spill] sm:$0xff]  ;;  %v5010_v32 = vld [vmem:[#allocation86_spill] sm:$0xff] }
 0x22c   :  { %v1114_v5 = vmul.f32 1.442695, %v4969_v19  ;;  %v3887_v35 = vmul.f32 1.442695, %v890_v53  ;;  %2539 = vpow2.f32 %v1074_v30  ;;  %v4970_v26 = vsub.f32 %v4864_v57, %v3682_v25  ;;  %v3903_v16 = vpop.eup %2521  ;;  %v4994_v30 = vld [vmem:[#allocation43_spill] sm:$0xff] }
 0x22d   :  { %v4971_v2 = vsub.f32 %v4940_v43, %v3682_v25  ;;  %v3901_v47 = vmul.f32 1.442695, %v896_v37  ;;  %4972 = vst [vmem:[#allocation17_spill] sm:$0xff] %v3903_v16  ;;  %v1218_v53 = vadd.f32 %v3732_v31, %v1217_v39  ;;  %2541 = vpow2.f32 %v1078_v20  ;;  %v3910_v61 = vpop.eup %2523  ;;  %v4982_v39 = vld [vmem:[#allocation19_spill] sm:$0xff] }
 0x22e   :  { %v3894_v59 = vmul.f32 1.442695, %v4970_v26  ;;  %v3906_v12 = vmul.f32 1.442695, %v898_v33  ;;  %v3908_v6 = vmul.f32 1.442695, %v900_v54  ;;  %2543 = vpow2.f32 %v1082_v34  ;;  %v3918_v25 = vpop.eup %2525 }
 0x22f   :  { %v3899_v36 = vmul.f32 1.442695, %v4971_v2  ;;  %4973 = vst [vmem:[#allocation20_spill] sm:$0xff] %v3910_v61  ;;  %v3912_v57 = vmul.f32 1.442695, %v902_v7  ;;  %v1236_v37 = vadd.f32 %v3903_v16, %v3889_v55  ;;  %4974 = vst [vmem:[#allocation23_spill] sm:$0xff] %v3918_v25  ;;  %v1219_v43 = vadd.f32 %v3738_v62, %v1218_v53  ;;  %v3925_v11 = vpop.eup %2527 }
 0x230   :  { %v3914_v18 = vmul.f32 1.442695, %v904_v3  ;;  %2545 = vpow2.f32 %v1086_v21  ;;  %v4975_v33 = vld [vmem:[#allocation8_spill] sm:$0xff]  ;;  %v4976_v54 = vld [vmem:[#allocation10_spill] sm:$0xff]  ;;  %4977 = vst [vmem:[#allocation26_spill] sm:$0xff] %v3925_v11  ;;  %v3932_v9 = vpop.eup %2529  ;;  %v4988_v26 = vld [vmem:[#allocation31_spill] sm:$0xff] }
 0x231   :  { %2547 = vpow2.f32 %v1090_v42  ;;  %v1237_v7 = vadd.f32 %v3910_v61, %v1236_v37  ;;  %v4978_v3 = vld [vmem:[#allocation12_spill] sm:$0xff]  ;;  %4980 = vst [vmem:[#allocation29_spill] sm:$0xff] %v3932_v9  ;;  %v1220_v21 = vadd.f32 %v3749_v49, %v1219_v43  ;;  %v3939_v42 = vpop.eup %2531  ;;  %v4984_v53 = vld [vmem:[#allocation22_spill] sm:$0xff]  ;;  %v4991_v34 = vld [vmem:[#allocation37_spill] sm:$0xff] }
 0x232   :  { %2549 = vpow2.f32 %v1094_v46  ;;  %4983 = vst [vmem:[#allocation32_spill] sm:$0xff] %v3939_v42  ;;  %v4987_v43 = vld [vmem:[#allocation28_spill] sm:$0xff]  ;;  %v4990_v37 = vld [vmem:[#allocation34_spill] sm:$0xff]  ;;  %v4998_v19 = vld [vmem:[#allocation55_spill] sm:$0xff]  ;;  %v5015_v49 = vsub.f32 %v4978_v3, %v3851_v41 }
 0x233   :  { %2551 = vpow2.f32 %v1098_v40  ;;  %v1238_v2 = vadd.f32 %v3918_v25, %v1237_v7  ;;  %v3946_v20 = vpop.eup %2533  ;;  %v1221_v46 = vadd.f32 %v3757_v52, %v1220_v21  ;;  %v4993_v21 = vld [vmem:[#allocation40_spill] sm:$0xff]  ;;  %v5002_v31 = vld [vmem:[#allocation67_spill] sm:$0xff]  ;;  %v5006_v61 = vld [vmem:[#allocation78_spill] sm:$0xff] }
 0x234   :  { %4986 = vst [vmem:[#allocation35_spill] sm:$0xff] %v3946_v20  ;;  %2553 = vpow2.f32 %v1102_v29  ;;  %v3953_v40 = vpop.eup %2535 }
 0x235   :  { %4989 = vst [vmem:[#allocation38_spill] sm:$0xff] %v3953_v40  ;;  %2555 = vpow2.f32 %v1106_v23  ;;  %v1239_v7 = vadd.f32 %v3925_v11, %v1238_v2  ;;  %v3960_v4 = vpop.eup %2537  ;;  %v1222_v29 = vadd.f32 %v3767_v0, %v1221_v46  ;;  %v4997_v46 = vld [vmem:[#allocation52_spill] sm:$0xff]  ;;  %v4999_v11 = vld [vmem:[#allocation58_spill] sm:$0xff] }
 0x236   :  { %4992 = vst [vmem:[#allocation41_spill] sm:$0xff] %v3960_v4  ;;  %2557 = vpow2.f32 %v1110_v48  ;;  %v3967_v23 = vpop.eup %2539 }
 0x237   :  { %2559 = vpow2.f32 %v1114_v5  ;;  %v1240_v2 = vadd.f32 %v3932_v9, %v1239_v7  ;;  %v3974_v62 = vpop.eup %2541  ;;  %v1223_v48 = vadd.f32 %v3775_v28, %v1222_v29  ;;  %v5000_v9 = vld [vmem:[#allocation61_spill] sm:$0xff]  ;;  %v5001_v5 = vld [vmem:[#allocation64_spill] sm:$0xff]  ;;  %v5003_v29 = vld [vmem:[#allocation70_spill] sm:$0xff] }
 0x238   :  { %2561 = vpow2.f32 %v3880_v56  ;;  %v3982_v0 = vpop.eup %2543 }
 0x239   :  { %2563 = vpow2.f32 %v3882_v63  ;;  %v1241_v7 = vadd.f32 %v3939_v42, %v1240_v2  ;;  %v1224_v56 = vadd.f32 %v3788_v38, %v1223_v48  ;;  %v5004_v42 = vld [vmem:[#allocation73_spill] sm:$0xff]  ;;  %v5005_v63 = vld [vmem:[#allocation75_spill] sm:$0xff]  ;;  %v5007_v48 = vld [vmem:[#allocation80_spill] sm:$0xff] }
 0x23a   :  { %v3990_v28 = vpop.eup %2545  ;;  %2565 = vpow2.f32 %v3885_v58 }
 0x23b   :  { %v3998_v25 = vpop.eup %2547  ;;  %2567 = vpow2.f32 %v3887_v35  ;;  %v1242_v2 = vadd.f32 %v3946_v20, %v1241_v7  ;;  %v1225_v58 = vadd.f32 %v3799_v14, %v1224_v56  ;;  %v5008_v20 = vld [vmem:[#allocation82_spill] sm:$0xff]  ;;  %v5009_v35 = vld [vmem:[#allocation84_spill] sm:$0xff] }
 0x23c   :  { %v4006_v38 = vpop.eup %2549  ;;  %2569 = vpow2.f32 %v3894_v59  ;;  %v5011_v56 = vld [vmem:[#allocation18_spill] sm:$0xff] }
 0x23d   :  { %v4014_v60 = vpop.eup %2551  ;;  %2571 = vpow2.f32 %v3899_v36  ;;  %v1243_v7 = vadd.f32 %v3953_v40, %v1242_v2  ;;  %v1226_v59 = vadd.f32 %v3810_v8, %v1225_v58  ;;  %v5012_v40 = vld [vmem:[#allocation24_spill] sm:$0xff]  ;;  %v5013_v36 = vsub.f32 %v4975_v33, %v3851_v41 }
 0x23e   :  { %v4022_v14 = vpop.eup %2553  ;;  %2573 = vpow2.f32 %v3901_v47  ;;  %v5016_v33 = vsub.f32 %v4979_v51, %v3851_v41  ;;  %v5020_v51 = vsub.f32 %v4984_v53, %v3851_v41 }
 0x23f   :  { %v4030_v16 = vpop.eup %2555  ;;  %2575 = vpow2.f32 %v3906_v12  ;;  %v1244_v2 = vadd.f32 %v3960_v4, %v1243_v7  ;;  %v1227_v47 = vadd.f32 %v3820_v22, %v1226_v59  ;;  %v1036_v52 = vmul.f32 1.442695, %v5013_v36 }
 0x240   :  { %v4038_v8 = vpop.eup %2557  ;;  %2577 = vpow2.f32 %v3908_v6  ;;  %v5014_v12 = vsub.f32 %v4976_v54, %v3851_v41  ;;  %v1044_v59 = vmul.f32 1.442695, %v5015_v49  ;;  %v1048_v54 = vmul.f32 1.442695, %v5016_v33 }
 0x241   :  { %v4048_v4 = vpop.eup %2559  ;;  %2579 = vpow2.f32 %v3912_v57  ;;  %v1245_v58 = vadd.f32 %v3967_v23, %v1244_v2  ;;  %v1228_v6 = vadd.f32 %v3831_v24, %v1227_v47  ;;  %v5017_v2 = vsub.f32 %v4981_v1, %v3851_v41 }
 0x242   :  { %v1040_v7 = vmul.f32 1.442695, %v5014_v12  ;;  %v4055_v22 = vpop.eup %2561  ;;  %2581 = vpow2.f32 %v3914_v18  ;;  %v5018_v49 = vsub.f32 %v4982_v39, %v3851_v41  ;;  %v1060_v33 = vmul.f32 1.442695, %v5020_v51 }
 0x243   :  { %v4062_v36 = vpop.eup %2563  ;;  %v1246_v57 = vadd.f32 %v3974_v62, %v1245_v58  ;;  %2583 = vpow2.f32 %v1036_v52  ;;  %v1052_v3 = vmul.f32 1.442695, %v5017_v2  ;;  %v4074_v18 = vadd.f32 %v3840_v10, %v1228_v6 }
 0x244   :  { %v1056_v12 = vmul.f32 1.442695, %v5018_v49  ;;  %v4071_v47 = vpop.eup %2565  ;;  %2585 = vpow2.f32 %v1040_v7  ;;  %v5021_v52 = vsub.f32 %v4985_v50, %v3851_v41  ;;  %v5022_v39 = vsub.f32 %v4987_v43, %v3851_v41 }
 0x245   :  { %5019 = vst [vmem:[#allocation44_spill] sm:$0xff] %v4074_v18  ;;  %v4082_v1 = vpop.eup %2567  ;;  %v1247_v2 = vadd.f32 %v3982_v0, %v1246_v57  ;;  %2587 = vpow2.f32 %v1044_v59  ;;  %v5023_v7 = vsub.f32 %v4988_v26, %v3851_v41  ;;  %v5024_v50 = vsub.f32 %v4990_v37, %v3851_v41 }
 0x246   :  { %v1064_v58 = vmul.f32 1.442695, %v5021_v52  ;;  %v1068_v49 = vmul.f32 1.442695, %v5022_v39  ;;  %v4091_v18 = vpop.eup %2569  ;;  %2589 = vpow2.f32 %v1048_v54  ;;  %v5025_v51 = vsub.f32 %v4991_v34, %v3851_v41 }
 0x247   :  { %v1072_v6 = vmul.f32 1.442695, %v5023_v7  ;;  %v1076_v53 = vmul.f32 1.442695, %v5024_v50  ;;  %v5026_v59 = vsub.f32 %v4993_v21, %v3851_v41  ;;  %v4102_v52 = vpop.eup %2571  ;;  %v1248_v26 = vadd.f32 %v3990_v28, %v1247_v2 }
 0x248   :  { %v1080_v57 = vmul.f32 1.442695, %v5025_v51  ;;  %2591 = vpow2.f32 %v1052_v3  ;;  %v5027_v54 = vsub.f32 %v4994_v30, %v3851_v41  ;;  %v5028_v37 = vsub.f32 %v4995_v13, %v3851_v41  ;;  %v4111_v50 = vpop.eup %2573 }
 0x249   :  { %v1084_v43 = vmul.f32 1.442695, %v5026_v59  ;;  %2593 = vpow2.f32 %v1056_v12  ;;  %v5029_v34 = vsub.f32 %v4996_v17, %v3851_v41  ;;  %v5030_v51 = vsub.f32 %v4997_v46, %v3851_v41  ;;  %v4122_v59 = vpop.eup %2575 }
 0x24a   :  { %v1088_v39 = vmul.f32 1.442695, %v5027_v54  ;;  %v1092_v7 = vmul.f32 1.442695, %v5028_v37  ;;  %v5031_v3 = vsub.f32 %v4998_v19, %v3851_v41  ;;  %v1249_v13 = vadd.f32 %v3998_v25, %v1248_v26  ;;  %v4135_v46 = vpop.eup %2577 }
 0x24b   :  { %v1096_v21 = vmul.f32 1.442695, %v5029_v34  ;;  %v1100_v2 = vmul.f32 1.442695, %v5030_v51  ;;  %2595 = vpow2.f32 %v1060_v33  ;;  %v5032_v12 = vsub.f32 %v4999_v11, %v3851_v41 }
 0x24c   :  { %v1104_v30 = vmul.f32 1.442695, %v5031_v3  ;;  %v5033_v17 = vsub.f32 %v5000_v9, %v3851_v41  ;;  %2597 = vpow2.f32 %v1064_v58  ;;  %v5034_v19 = vsub.f32 %v5001_v5, %v3851_v41  ;;  %v4152_v9 = vpop.eup %2579 }
 0x24d   :  { %v4128_v54 = vmul.f32 1.442695, %v5032_v12  ;;  %v5035_v33 = vsub.f32 %v5002_v31, %v3851_v41  ;;  %v5036_v11 = vsub.f32 %v5003_v29, %v3851_v41  ;;  %v1250_v3 = vadd.f32 %v4006_v38, %v1249_v13 }
 0x24e   :  { %v4133_v37 = vmul.f32 1.442695, %v5033_v17  ;;  %v4140_v34 = vmul.f32 1.442695, %v5034_v19  ;;  %2599 = vpow2.f32 %v1068_v49  ;;  %v5037_v5 = vsub.f32 %v5004_v42, %v3851_v41  ;;  %v4165_v17 = vpop.eup %2581 }
 0x24f   :  { %v4145_v26 = vmul.f32 1.442695, %v5035_v33  ;;  %v4150_v51 = vmul.f32 1.442695, %v5036_v11  ;;  %v5038_v31 = vsub.f32 %v5005_v63, %v3851_v41  ;;  %2601 = vpow2.f32 %v1072_v6  ;;  %v2584_v63 = vpop.eup %2583 }
 0x250   :  { %v4158_v58 = vmul.f32 1.442695, %v5037_v5  ;;  %v5039_v29 = vsub.f32 %v5006_v61, %v3851_v41  ;;  %v5040_v49 = vsub.f32 %v5007_v48, %v3851_v41  ;;  %v5041_v42 = vsub.f32 %v5008_v20, %v3851_v41 }
 0x251   :  { %v4163_v12 = vmul.f32 1.442695, %v5038_v31  ;;  %v1251_v11 = vadd.f32 %v4014_v60, %v1250_v3  ;;  %2603 = vpow2.f32 %v1076_v53  ;;  %v5042_v6 = vsub.f32 %v5009_v35, %v3851_v41  ;;  %v2586_v31 = vpop.eup %2585 }
 0x252   :  { %v4170_v19 = vmul.f32 1.442695, %v5039_v29  ;;  %v4175_v13 = vmul.f32 1.442695, %v5040_v49  ;;  %v4180_v33 = vmul.f32 1.442695, %v5041_v42  ;;  %v5043_v5 = vsub.f32 %v5010_v32, %v3851_v41  ;;  %v2588_v49 = vpop.eup %2587 }
 0x253   :  { %v4186_v61 = vmul.f32 1.442695, %v5042_v6  ;;  %2605 = vpow2.f32 %v1080_v57  ;;  %v5045_v20 = vsub.f32 %v5011_v56, %v3851_v41  ;;  %v5047_v53 = vsub.f32 %v5012_v40, %v3851_v41  ;;  %v2590_v6 = vpop.eup %2589  ;;  %v5050_v40 = vld [vmem:[#allocation87_spill] sm:$0xff] }
 0x254   :  { %v4191_v48 = vmul.f32 1.442695, %v5043_v5  ;;  %v1325_v35 = vpack.c.bf16 %v3694_v15, %v3688_v27  ;;  %v1252_v32 = vadd.f32 %v4022_v14, %v1251_v11  ;;  %2607 = vpow2.f32 %v1084_v43  ;;  %v5049_v5 = vld [vmem:[#allocation17_spill] sm:$0xff]  ;;  %v5052_v43 = vld [vmem:[#allocation36_spill] sm:$0xff] }
 0x255   :  { %v4196_v29 = vmul.f32 1.442695, %v5045_v20  ;;  %v4201_v3 = vmul.f32 1.442695, %v5047_v53  ;;  %v1273_v42 = vadd.f32 %v2586_v31, %v2584_v63  ;;  %v1327_v57 = vpack.c.bf16 %v3708_v44, %v3703_v45  ;;  %v5051_v20 = vld [vmem:[#allocation21_spill] sm:$0xff] }
 0x256   :  { %5044 = vst [vmem:[#allocation47_spill] sm:$0xff] %v4191_v48  ;;  %2609 = vpow2.f32 %v1088_v39  ;;  %1392 = vmatprep.subr.bf16.mxu0 %v1325_v35  ;;  %v1343_v56 = vpack.c.bf16 %v2586_v31, %v2584_v63  ;;  %v1342_v41 = vpack.c.bf16 %v5049_v5, %v3889_v55  ;;  %v1329_v53 = vpack.c.bf16 %v5051_v20, %v5050_v40  ;;  %v5053_v11 = vld [vmem:[#allocation33_spill] sm:$0xff]  ;;  %v5055_v39 = vld [vmem:[#allocation20_spill] sm:$0xff]  ;;  %v5056_v63 = vld [vmem:[#allocation23_spill] sm:$0xff] }
 0x257   :  { %5046 = vst [vmem:[#allocation50_spill] sm:$0xff] %v4196_v29  ;;  %5048 = vst [vmem:[#allocation53_spill] sm:$0xff] %v4201_v3  ;;  %v2592_v3 = vpop.eup %2591  ;;  %v1253_v27 = vadd.f32 %v4030_v16, %v1252_v32  ;;  %2611 = vpow2.f32 %v1092_v7  ;;  %v1274_v15 = vadd.f32 %v2588_v49, %v1273_v42  ;;  %v5054_v29 = vpack.c.bf16 %v5052_v43, %v5053_v11  ;;  %v5057_v31 = vld [vmem:[#allocation57_spill] sm:$0xff]  ;;  %v5058_v35 = vld [vmem:[#allocation63_spill] sm:$0xff] }
 0x258   :  { %v1345_v45 = vpack.c.bf16 %v2590_v6, %v2588_v49  ;;  %v2594_v44 = vpop.eup %2593  ;;  %2613 = vpow2.f32 %v1096_v21  ;;  %1421 = vmatprep.subr.bf16.mxu1 %v1343_v56  ;;  %v1344_v55 = vpack.c.bf16 %v5056_v63, %v5055_v39  ;;  %v1331_v5 = vpack.c.bf16 %v5058_v35, %v5057_v31  ;;  %v5059_v40 = vld [vmem:[#allocation26_spill] sm:$0xff]  ;;  %v5060_v20 = vld [vmem:[#allocation29_spill] sm:$0xff]  ;;  %v5063_v11 = vld [vmem:[#allocation32_spill] sm:$0xff] }
 0x259   :  { %1393 = vmatpush1.bf16.msra.mxu0 %v5054_v29  ;;  %v1346_v32 = vpack.c.bf16 %v5060_v20, %v5059_v40  ;;  %v2596_v7 = vpop.eup %2595  ;;  %v1254_v42 = vadd.f32 %v4038_v8, %v1253_v27  ;;  %2615 = vpow2.f32 %v1100_v2  ;;  %v1275_v43 = vadd.f32 %v2590_v6, %v1274_v15  ;;  %1422 = vmatpush1.bf16.msra.mxu1 %v1342_v41  ;;  %v5061_v21 = vld [vmem:[#allocation66_spill] sm:$0xff]  ;;  %v5064_v39 = vld [vmem:[#allocation35_spill] sm:$0xff]  ;;  %v5066_v35 = vld [vmem:[#allocation72_spill] sm:$0xff] }
 0x25a   :  { %1394 = vmatprep.subr.bf16.mxu0 %v1327_v57  ;;  %v1347_v29 = vpack.c.bf16 %v2594_v44, %v2592_v3  ;;  %v2598_v49 = vpop.eup %2597  ;;  %2617 = vpow2.f32 %v1104_v30  ;;  %1423 = vmatprep.subr.bf16.mxu1 %v1345_v45  ;;  %v5062_v57 = vld [vmem:[#allocation60_spill] sm:$0xff]  ;;  %v5067_v6 = vld [vmem:[#allocation42_spill] sm:$0xff]  ;;  %v5068_v41 = vld [vmem:[#allocation39_spill] sm:$0xff] }
 0x25b   :  { %v1333_v56 = vpack.c.bf16 %v5062_v57, %v5061_v21  ;;  %v4229_v40 = vpop.eup %2599  ;;  %v1255_v27 = vadd.f32 %v4048_v4, %v1254_v42  ;;  %2619 = vpow2.f32 %v4128_v54  ;;  %v1276_v2 = vadd.f32 %v2592_v3, %v1275_v43  ;;  %v5070_v20 = vld [vmem:[#allocation38_spill] sm:$0xff]  ;;  %v5071_v21 = vld [vmem:[#allocation41_spill] sm:$0xff]  ;;  %v5072_v48 = vld [vmem:[#allocation7_spill] sm:$0xff] }
 0x25c   :  { %v5069_v30 = vpack.c.bf16 %v5067_v6, %v5068_v41  ;;  %v1349_v15 = vpack.c.bf16 %v2598_v49, %v2596_v7  ;;  %v2602_v45 = vpop.eup %2601  ;;  %2621 = vpow2.f32 %v4133_v37  ;;  %v1350_v57 = vpack.c.bf16 %v5071_v21, %v5070_v20  ;;  %v5073_v63 = vld [vmem:[#allocation9_spill] sm:$0xff]  ;;  %v5074_v6 = vld [vmem:[#allocation11_spill] sm:$0xff] }
 0x25d   :  { %v4243_v54 = vpop.eup %2603  ;;  %v1256_v3 = vadd.f32 %v4055_v22, %v1255_v27  ;;  %2623 = vpow2.f32 %v4140_v34  ;;  %v1277_v43 = vadd.f32 %v2594_v44, %v1276_v2  ;;  %1424 = vmatpush1.bf16.msra.mxu1 %v1344_v55  ;;  %v1351_v37 = vpack.c.bf16 %v2602_v45, %v4229_v40  ;;  %v5075_v41 = vld [vmem:[#allocation13_spill] sm:$0xff]  ;;  %v5076_v55 = vld [vmem:[#allocation48_spill] sm:$0xff] }
 0x25e   :  { %1395 = vmatpush1.bf16.msra.mxu0 %v5069_v30  ;;  %2625 = vpow2.f32 %v4145_v26  ;;  %1425 = vmatprep.subr.bf16.mxu1 %v1347_v29  ;;  %v1354_v42 = vpack.c.bf16 %v3990_v28, %v3982_v0  ;;  %v5077_v2 = vld [vmem:[#allocation45_spill] sm:$0xff]  ;;  %v1356_v27 = vpack.c.bf16 %v4006_v38, %v3998_v25  ;;  %v5108_v38 = vpack.c.bf16 %v4038_v8, %v4030_v16 }
 0x25f   :  { %1396 = vmatprep.subr.bf16.mxu0 %v1329_v53  ;;  %v4248_v53 = vpop.eup %2605  ;;  %v1257_v34 = vadd.f32 %v4062_v36, %v1256_v3  ;;  %2627 = vpow2.f32 %v4150_v51  ;;  %v1278_v44 = vadd.f32 %v2596_v7, %v1277_v43  ;;  %v5078_v26 = vpack.c.bf16 %v5076_v55, %v5077_v2  ;;  %v5104_v28 = vld [vmem:[#allocation93_spill] sm:$0xff] }
 0x260   :  { %v4257_v31 = vpop.eup %2607  ;;  %v1353_v29 = vpack.c.bf16 %v4248_v53, %v4243_v54  ;;  %2629 = vpow2.f32 %v4158_v58  ;;  %v1358_v3 = vpack.c.bf16 %v4022_v14, %v4014_v60  ;;  %v5110_v14 = vpack.c.bf16 %v4071_v47, %v4062_v36 }
 0x261   :  { %v4266_v30 = vpop.eup %2609  ;;  %v1258_v43 = vadd.f32 %v4071_v47, %v1257_v34  ;;  %2631 = vpow2.f32 %v4163_v12  ;;  %v1279_v55 = vadd.f32 %v2598_v49, %v1278_v44  ;;  %1426 = vmatpush1.bf16.msra.mxu1 %v1346_v32  ;;  %v5079_v44 = vld [vmem:[#allocation54_spill] sm:$0xff]  ;;  %v5111_v8 = vpack.c.bf16 %v4091_v18, %v4082_v1 }
 0x262   :  { %1397 = vmatpush1.bf16.msra.mxu0 %v5078_v26  ;;  %v4275_v7 = vpop.eup %2611  ;;  %v1355_v58 = vpack.c.bf16 %v4266_v30, %v4257_v31  ;;  %2633 = vpow2.f32 %v4170_v19  ;;  %1427 = vmatprep.subr.bf16.mxu1 %v1349_v15  ;;  %v5080_v19 = vld [vmem:[#allocation51_spill] sm:$0xff]  ;;  %v5084_v34 = vld [vmem:[#allocation50_spill] sm:$0xff]  ;;  %v5089_v26 = vld [vmem:[#allocation89_spill] sm:$0xff]  ;;  %v5113_v36 = vpack.c.bf16 %v4135_v46, %v4122_v59  ;;  %v5114_v47 = vpack.c.bf16 %v4165_v17, %v4152_v9 }
 0x263   :  { %1398 = vmatprep.subr.bf16.mxu0 %v1331_v5  ;;  %v4281_v5 = vpop.eup %2613  ;;  %v1259_v32 = vadd.f32 %v4082_v1, %v1258_v43  ;;  %2635 = vpow2.f32 %v4175_v13  ;;  %v1280_v49 = vadd.f32 %v4229_v40, %v1279_v55  ;;  %v5081_v15 = vpack.c.bf16 %v5079_v44, %v5080_v19 }
 0x264   :  { %v4290_v12 = vpop.eup %2615  ;;  %v1357_v2 = vpack.c.bf16 %v4281_v5, %v4275_v7  ;;  %2637 = vpow2.f32 %v4180_v33  ;;  %v5082_v33 = vpack.c.bf16 %v5064_v39, %v5063_v11  ;;  %v2704_v1 = vmov 0.0  }
 0x265   :  { %v4300_v51 = vpop.eup %2617  ;;  %v1260_v55 = vadd.f32 %v4091_v18, %v1259_v32  ;;  %2639 = vpow2.f32 %v4186_v61  ;;  %v1281_v44 = vadd.f32 %v2602_v45, %v1280_v49  ;;  %v5085_v61 = vld [vmem:[#allocation90_spill] sm:$0xff]  ;;  %v5086_v45 = vld [vmem:[#allocation69_spill] sm:$0xff] }
 0x266   :  { %1399 = vmatpush1.bf16.msra.mxu0 %v5081_v15  ;;  %v4309_v43 = vpop.eup %2619  ;;  %1428 = vmatpush1.bf16.msra.mxu1 %v5082_v33  ;;  %v5083_v15 = vld [vmem:[#allocation47_spill] sm:$0xff]  ;;  %v5087_v49 = vpack.c.bf16 %v5085_v61, %v5086_v45  ;;  %v5088_v33 = vld [vmem:[#allocation53_spill] sm:$0xff]  ;;  %v5115_v18 = vld [vmem:[#allocation6_spill] sm:$0xff] }
 0x267   :  { %1400 = vmatprep.subr.bf16.mxu0 %v1333_v56  ;;  %v1359_v56 = vpack.c.bf16 %v4300_v51, %v4290_v12  ;;  %v2622_v19 = vpop.eup %2621  ;;  %2641 = vpow2.f32 %v5083_v15  ;;  %1429 = vmatprep.subr.bf16.mxu1 %v1351_v37  ;;  %v1261_v40 = vadd.f32 %v4102_v52, %v1260_v55  ;;  %v1282_v32 = vadd.f32 %v4243_v54, %v1281_v44 }
 0x268   :  { %v2624_v13 = vpop.eup %2623  ;;  %2643 = vpow2.f32 %v5084_v34  ;;  %v1361_v11 = vpack.c.bf16 %v2622_v19, %v4309_v43  ;;  %v5090_v15 = vpack.c.bf16 %v5066_v35, %v5089_v26  ;;  %v5092_v35 = vld [vmem:[#allocation77_spill] sm:$0xff] }
 0x269   :  { %v2626_v39 = vpop.eup %2625  ;;  %2645 = vpow2.f32 %v5088_v33  ;;  %v1262_v55 = vadd.f32 %v4111_v50, %v1261_v40  ;;  %v1283_v34 = vadd.f32 %v4248_v53, %v1282_v32  ;;  %v5091_v33 = vld [vmem:[#allocation76_spill] sm:$0xff]  ;;  %v5094_v53 = vpack.c.bf16 %v5073_v63, %v5072_v48 }
 0x26a   :  { %1401 = vmatpush1.bf16.msra.mxu0 %v5087_v49  ;;  %v2628_v37 = vpop.eup %2627  ;;  %1430 = vmatpush1.bf16.msra.mxu1 %v1350_v57  ;;  %v1363_v54 = vpack.c.bf16 %v2626_v39, %v2624_v13  ;;  %v5093_v26 = vpack.c.bf16 %v5091_v33, %v5092_v35  ;;  %v5096_v35 = vld [vmem:[#allocation91_spill] sm:$0xff]  ;;  %v5097_v48 = vld [vmem:[#allocation88_spill] sm:$0xff] }
 0x26b   :  { %1402 = vmatprep.subr.bf16.mxu0 %v5090_v15  ;;  %v2630_v44 = vpop.eup %2629  ;;  %1431 = vmatprep.subr.bf16.mxu1 %v1353_v29  ;;  %v1263_v45 = vadd.f32 %v4122_v59, %v1262_v55  ;;  %v1284_v49 = vadd.f32 %v4257_v31, %v1283_v34  ;;  %v5095_v29 = vpack.c.bf16 %v3974_v62, %v3967_v23 }
 0x26c   :  { %v2632_v61 = vpop.eup %2631  ;;  %v1365_v15 = vpack.c.bf16 %v2630_v44, %v2628_v37  ;;  %v5098_v63 = vpack.c.bf16 %v5096_v35, %v5097_v48 }
 0x26d   :  { %v2634_v40 = vpop.eup %2633  ;;  %v1264_v21 = vadd.f32 %v4135_v46, %v1263_v45  ;;  %v1285_v57 = vadd.f32 %v4266_v30, %v1284_v49  ;;  %v5099_v30 = vpack.c.bf16 %v5075_v41, %v5074_v6  ;;  %v5103_v41 = vpack.c.bf16 %v3840_v10, %v3831_v24  ;;  %v5107_v24 = vld [vmem:[#allocation5_spill] sm:$0xff] }
 0x26e   :  { %1403 = vmatpush1.bf16.msra.mxu0 %v5093_v26  ;;  %v2636_v20 = vpop.eup %2635  ;;  %1432 = vmatpush1.bf16.msra.mxu1 %v5095_v29  ;;  %v1367_v31 = vpack.c.bf16 %v2634_v40, %v2632_v61 }
 0x26f   :  { %1404 = vmatprep.subr.bf16.mxu0 %v5094_v53  ;;  %v2638_v32 = vpop.eup %2637  ;;  %1433 = vmatprep.subr.bf16.mxu1 %v1355_v58  ;;  %v1265_v34 = vadd.f32 %v4152_v9, %v1264_v21  ;;  %v1286_v33 = vadd.f32 %v4275_v7, %v1285_v57  ;;  %v5100_v21 = vld [vmem:[#allocation92_spill] sm:$0xff]  ;;  %v5101_v57 = vld [vmem:[#allocation83_spill] sm:$0xff] }
 0x270   :  { %v2640_v55 = vpop.eup %2639  ;;  %v1369_v26 = vpack.c.bf16 %v2638_v32, %v2636_v20  ;;  %v5102_v29 = vpack.c.bf16 %v5100_v21, %v5101_v57 }
 0x271   :  { %v2642_v45 = vpop.eup %2641  ;;  %v4357_v23 = vadd.f32 %v4165_v17, %v1265_v34  ;;  %v1287_v58 = vadd.f32 %v4281_v5, %v1286_v33 }
 0x272   :  { %1405 = vmatpush1.bf16.msra.mxu0 %v5098_v63  ;;  %v2644_v62 = vpop.eup %2643  ;;  %1434 = vmatpush1.bf16.msra.mxu1 %v1354_v42  ;;  %v1371_v7 = vpack.c.bf16 %v2642_v45, %v2640_v55  ;;  %v5105_v42 = vld [vmem:[#allocation85_spill] sm:$0xff] }
 0x273   :  { %1406 = vmatprep.subr.bf16.mxu0 %v5099_v30  ;;  %v2646_v49 = vpop.eup %2645  ;;  %1435 = vmatprep.subr.bf16.mxu1 %v1357_v2  ;;  %v1288_v53 = vadd.f32 %v4290_v12, %v1287_v58  ;;  %v5106_v2 = vpack.c.bf16 %v5104_v28, %v5105_v42 }
 0x274   :  { %v1373_v6 = vpack.c.bf16 %v2646_v49, %v2644_v62 }
 0x275   :  { %v1289_v5 = vadd.f32 %v4300_v51, %v1288_v53 }
 0x276   :  { %1407 = vmatpush1.bf16.msra.mxu0 %v5102_v29  ;;  %1436 = vmatpush1.bf16.msra.mxu1 %v1356_v27 }
 0x277   :  { %1408 = vmatprep.subr.bf16.mxu0 %v5103_v41  ;;  %1437 = vmatprep.subr.bf16.mxu1 %v1359_v56  ;;  %v1290_v0 = vadd.f32 %v4309_v43, %v1289_v5  ;;  %v5109_v43 = vpack.c.bf16 %v4055_v22, %v4048_v4  ;;  %v5112_v4 = vpack.c.bf16 %v4111_v50, %v4102_v52  ;;  %v5116_v52 = vld [vmem:[#allocation15_spill] sm:$0xff] }
 0x278   :  { %v1193_v50 = vrot.slane %v5116_v52, 4 }
 0x279   :  { %v1291_v12 = vadd.f32 %v2622_v19, %v1290_v0 }
 0x27a   :  { %1409 = vmatpush1.bf16.msra.mxu0 %v5106_v2  ;;  %1438 = vmatpush1.bf16.msra.mxu1 %v1358_v3 }
 0x27b   :  { %1439 = vmatprep.subr.bf16.mxu1 %v1361_v11  ;;  %v1292_v10 = vadd.f32 %v2624_v13, %v1291_v12 }
 0x27d   :  { %1411 = vmatmul.mubr.bf16.vlgmr.msra.gmra.mrb[64].mxu0 %v5107_v24  ;;  %v1293_v51 = vadd.f32 %v2626_v39, %v1292_v10  ;;  %v5117_v39 = vld [vmem:[#allocation44_spill] sm:$0xff] }
 0x27e   :  { %1440 = vmatpush1.bf16.msra.mxu1 %v5108_v38  ;;  %1543 = vmatprep.mubr.f32.mxu0 %v2704_v1 }
 0x27f   :  { %1441 = vmatprep.subr.bf16.mxu1 %v1363_v54  ;;  %v1294_v25 = vadd.f32 %v2628_v37, %v1293_v51  ;;  %v1230_v37 = vrot.slane %v5117_v39, 4  ;;  %v1194_v54 = vadd.f32 %v1193_v50, %v5116_v52 }
 0x281   :  { %v1295_v27 = vadd.f32 %v2630_v44, %v1294_v25  ;;  %v1231_v59 = vadd.f32 %v1230_v37, %v5117_v39  ;;  %v1195_v46 = vrot.slane %v1194_v54, 2  ;;  %v2706_v39 = vmov 9  }
 0x282   :  { %1442 = vmatpush1.bf16.msra.mxu1 %v5109_v43  ;;  %2388 = vset.pattern.permute.xlu0 %v2706_v39 }
 0x283   :  { %1443 = vmatprep.subr.bf16.mxu1 %v1365_v15  ;;  %v1296_v56 = vadd.f32 %v2632_v61, %v1295_v27  ;;  %v1232_v44 = vrot.slane %v1231_v59, 2  ;;  %v1196_v61 = vadd.f32 %v1195_v46, %v1194_v54 }
 0x285   :  { %v1297_v60 = vadd.f32 %v2634_v40, %v1296_v56  ;;  %v1233_v9 = vadd.f32 %v1232_v44, %v1231_v59  ;;  %v1197_v17 = vrot.slane %v1196_v61, 1 }
 0x286   :  { %1444 = vmatpush1.bf16.msra.mxu1 %v5110_v14 }
 0x287   :  { %1445 = vmatprep.subr.bf16.mxu1 %v1367_v31  ;;  %v1298_v3 = vadd.f32 %v2636_v20, %v1297_v60  ;;  %v1234_v15 = vrot.slane %v1233_v9, 1  ;;  %v1198_v40 = vadd.f32 %v1197_v17, %v1196_v61  ;;  %v1267_v31 = vrot.slane %v4357_v23, 4 }
 0x289   :  { %v1299_v13 = vadd.f32 %v2638_v32, %v1298_v3  ;;  %v1235_v20 = vadd.f32 %v1234_v15, %v1233_v9  ;;  %2647 = vrcp.f32 %v1198_v40  ;;  %v1268_v34 = vadd.f32 %v1267_v31, %v4357_v23 }
 0x28a   :  { %1446 = vmatpush1.bf16.msra.mxu1 %v5111_v8 }
 0x28b   :  { %1447 = vmatprep.subr.bf16.mxu1 %v1369_v26  ;;  %v1300_v16 = vadd.f32 %v2640_v55, %v1299_v13  ;;  %2649 = vrcp.f32 %v1235_v20 }
 0x28d   :  { %v1301_v19 = vadd.f32 %v2642_v45, %v1300_v16 }
 0x28e   :  { %1448 = vmatpush1.bf16.msra.mxu1 %v5112_v4  ;;  %v2705_v4 = vmov 8  }
 0x28f   :  { %1449 = vmatprep.subr.bf16.mxu1 %v1371_v7  ;;  %v1302_v22 = vadd.f32 %v2644_v62, %v1301_v19  ;;  %v4415_v62 = vld [vmem:[%s4506_s1] sm:$0xff]  ;;  %v1269_v7 = vrot.slane %v1268_v34, 2  ;;  %2383 = vset.pattern.permute.xlu1 %v2705_v4 }
 0x291   :  { %v1303_v11 = vadd.f32 %v2646_v49, %v1302_v22  ;;  %v1270_v49 = vadd.f32 %v1269_v7, %v1268_v34 }
 0x292   :  { %1450 = vmatpush1.bf16.msra.mxu1 %v5113_v36 }
 0x293   :  { %1451 = vmatprep.subr.bf16.mxu1 %v1373_v6  ;;  %v1304_v32 = vrot.slane %v1303_v11, 4  ;;  %v2648_v55 = vpop.eup %2647  ;;  %v1271_v21 = vrot.slane %v1270_v49, 1 }
 0x295   :  { %v2650_v35 = vpop.eup %2649  ;;  %v1305_v48 = vadd.f32 %v1304_v32, %v1303_v11  ;;  %v1272_v29 = vadd.f32 %v1271_v21, %v1270_v49 }
 0x296   :  { %1452 = vmatpush1.bf16.msra.mxu1 %v5114_v47 }
 0x297   :  { %v1306_v23 = vrot.slane %v1305_v48, 2  ;;  %2651 = vrcp.f32 %v1272_v29 }
 0x299   :  { %1454 = vmatmul.mubr.bf16.vlgmr.msra.gmra.mrb[64].mxu1 %v5115_v18  ;;  %v1307_v53 = vadd.f32 %v1306_v23, %v1305_v48 }
 0x29a   :  { %1614 = vmatprep.mubr.f32.mxu1 %v2704_v1 }
 0x29b   :  { %v1308_v57 = vrot.slane %v1307_v53, 1 }
 0x29d   :  { %v1309_v6 = vadd.f32 %v1308_v57, %v1307_v53 }
 0x29f   :  { %2653 = vrcp.f32 %v1309_v6 }
 0x2a1   :  { %v2652_v41 = vpop.eup %2651 }
 0x2a9   :  { %v2654_v0 = vpop.eup %2653 }
 0x350   :  { %v1412_v33 = vpop.f32.mrb[64].mxu0 }
 0x351   :  { %v1419_v63 = vmul.f32 %v2648_v55, %v1412_v33  ;;  %v1414_v26 = vpop.f32.mrb[65].mxu0 }
 0x352   :  { %v1420_v45 = vmul.f32 %v2650_v35, %v1414_v26  ;;  %v1416_v30 = vpop.f32.mrb[66].mxu0  ;;  %v18_v26 = vld [vmem:[%s4506_s1 + $0x8] sm:$0xff] }
 0x353   :  { %v1417_v58 = vpop.f32.mrb[67].mxu0 }
 0x354   :  { %2363 = vmatprep.subr.msk.mxu0 %vm34_vm2, %v1420_v45 }
 0x355   :  { %2364 = vmatpush1.msk.msra.mxu0 %vm34_vm2, %v1419_v63 }
 0x356   :  { %2365 = vmatmul.mubr.msk.f32.vlgmr.msra.gmra.mrb[68].mxu0 %vm102_vm1, %v4415_v62 }
 0x357   :  { %1738 = vmatprep.mubr.f32.mxu0 %v2704_v1 }
 0x36c   :  { %v1455_v5 = vpop.f32.mrb[64].mxu1 }
 0x36d   :  { %v1462_v28 = vmul.f32 %v2652_v41, %v1455_v5  ;;  %v1457_v42 = vpop.f32.mrb[65].mxu1 }
 0x36e   :  { %v1463_v2 = vmul.f32 %v2654_v0, %v1457_v42  ;;  %v1459_v12 = vpop.f32.mrb[66].mxu1 }
 0x36f   :  { %v1460_v24 = vpop.f32.mrb[67].mxu1 }
 0x370   :  { %2366 = vmatprep.subr.msk.mxu1 %vm34_vm2, %v1463_v2 }
 0x371   :  { %2367 = vmatpush1.msk.msra.mxu1 %vm34_vm2, %v1462_v28 }
 0x372   :  { %2368 = vmatmul.mubr.msk.f32.vlgmr.msra.gmra.mrb[68].mxu1 %vm102_vm1, %v4415_v62 }
 0x373   :  { %1809 = vmatprep.mubr.f32.mxu1 %v2704_v1 }
 0x429   :  { %v1545_v10 = vpop.f32.mrb[68].mxu0 }
 0x42a   :  { %v1626_v51 = vmul.f32 %v1545_v10, %v1545_v10  ;;  %v1547_v38 = vpop.f32.mrb[69].mxu0 }
 0x42b   :  { %v1621_v25 = vadd.f32 %v1547_v38, %v1545_v10  ;;  %v1627_v27 = vmul.f32 %v1547_v38, %v1547_v38 }
 0x42d   :  { %v1630_v43 = vadd.f32 %v1627_v27, %v1626_v51 }
 0x445   :  { %v1616_v56 = vpop.f32.mrb[68].mxu1 }
 0x446   :  { %v1628_v60 = vmul.f32 %v1616_v56, %v1616_v56  ;;  %v1618_v14 = vpop.f32.mrb[69].mxu1  ;;  %v1622_v3 = vadd.f32 %v1621_v25, %v1616_v56 }
 0x447   :  { %v1629_v13 = vmul.f32 %v1618_v14, %v1618_v14 }
 0x448   :  { %v1623_v8 = vadd.f32 %v1622_v3, %v1618_v14  ;;  %v1631_v16 = vadd.f32 %v1630_v43, %v1628_v60 }
 0x44a   :  { %1624 = vadd.xlane.f32.xlu0 %v1623_v8  ;;  %v1632_v19 = vadd.f32 %v1631_v16, %v1629_v13 }
 0x44c   :  { %1633 = vadd.xlane.f32.xlu1 %v1632_v19 }
 0x4d7   :  { %v1625_v22 = vpop.xlane.xlu0 %1624 }
 0x4d8   :  { %v1635_v11 = vmul.f32 0.001953125, %v1625_v22 }
 0x4d9   :  { %v1634_v36 = vpop.xlane.xlu1 %1633 }
 0x4da   :  { %v1637_v47 = vmul.f32 %v1635_v11, %v1635_v11  ;;  %v1636_v18 = vmul.f32 0.001953125, %v1634_v36 }
 0x4dc   :  { %v1638_v52 = vsub.f32 %v1636_v18, %v1637_v47 }
 0x4de   :  { %v1639_v50 = vadd.f32 1e-05, %v1638_v52 }
 0x4e0   :  { %2655 = vrsqrt.f32 %v1639_v50  ;;  %v19_v50 = vld [vmem:[%s4506_s1 + $0x10] sm:$0xff] }
 0x4ea   :  { %v2656_v37 = vpop.eup %2655 }
 0x4eb   :  { %v1641_v54 = vmul.f32 %v2656_v37, %v4415_v62 }
 0x4ed   :  { %1650 = vperm.xlu1 %2383, %v1641_v54   ;;  %v1642_v59 = vmul.f32 %v1641_v54, %v1635_v11 }
 0x4ef   :  { %1644 = vrot.lane.b32.xlu0 %v1642_v59, %s2707_s18 }
 0x4f1   :  { %2384 = vset.pattern.permute.xlu1 %v2706_v39 }
 0x561   :  { %v1645_v46 = vpop.permute.xlu0 %1644 }
 0x562   :  { %v1647_v44 = vsub.f32 %v4415_v62, %v1645_v46 }
 0x564   :  { %1659 = vperm.xlu1 %2384, %v1647_v44  }
 0x568   :  { %2385 = vset.pattern.permute.xlu1 %v2705_v4 }
 0x56c   :  { %v1651_v61 = vpop.permute.xlu1 %1650 }
 0x56d   :  { %v1653_v9 = vmul.f32 %v1651_v61, %v1545_v10  ;;  %v1654_v17 = vmul.f32 %v1651_v61, %v1547_v38  ;;  %v1655_v15 = vmul.f32 %v1651_v61, %v1616_v56  ;;  %v1656_v40 = vmul.f32 %v1651_v61, %v1618_v14 }
 0x5e3   :  { %v1660_v20 = vpop.permute.xlu1 %1659 }
 0x5e4   :  { %v1662_v31 = vadd.f32 %v1660_v20, %v1653_v9  ;;  %v1664_v32 = vadd.f32 %v1660_v20, %v1655_v15  ;;  %v1663_v55 = vadd.f32 %v1660_v20, %v1654_v17  ;;  %v1665_v34 = vadd.f32 %v1660_v20, %v1656_v40 }
 0x5e6   :  { %v1666_v33 = vmax.f32 %v1662_v31, 0.0  ;;  %v1668_v35 = vmax.f32 %v1664_v32, 0.0  ;;  %v1667_v48 = vmax.f32 %v1663_v55, 0.0  ;;  %v1669_v63 = vmax.f32 %v1665_v34, 0.0 }
 0x5e8   :  { %1674 = vmatprep.subr.mxu0 %v1667_v48  ;;  %1745 = vmatprep.subr.mxu1 %v1669_v63 }
 0x5e9   :  { %1675 = vmatpush1.msra.mxu0 %v1666_v33  ;;  %1746 = vmatpush1.msra.mxu1 %v1668_v35 }
 0x5ea   :  { %2369 = vmatmul.mubr.msk.f32.vlgmr.msra.gmra.mrb[70].mxu0 %vm1670_vm3, %v18_v26  ;;  %2370 = vmatmul.mubr.msk.f32.vlgmr.msra.gmra.mrb[70].mxu1 %vm1670_vm3, %v18_v26 }
 0x5eb   :  { %1932 = vmatprep.mubr.f32.mxu0 %v2704_v1  ;;  %2003 = vmatprep.mubr.f32.mxu1 %v2704_v1 }
 0x6bd   :  { %v1740_v45 = vpop.f32.mrb[70].mxu0  ;;  %v1811_v30 = vpop.f32.mrb[70].mxu1 }
 0x6be   :  { %v1821_v62 = vmul.f32 %v1740_v45, %v1740_v45  ;;  %v1742_v58 = vpop.f32.mrb[71].mxu0  ;;  %v1813_v7 = vpop.f32.mrb[71].mxu1  ;;  %v1823_v53 = vmul.f32 %v1811_v30, %v1811_v30 }
 0x6bf   :  { %v1816_v23 = vadd.f32 %v1742_v58, %v1740_v45  ;;  %v1822_v49 = vmul.f32 %v1742_v58, %v1742_v58  ;;  %v1824_v6 = vmul.f32 %v1813_v7, %v1813_v7 }
 0x6c1   :  { %v1817_v21 = vadd.f32 %v1816_v23, %v1811_v30  ;;  %v1825_v57 = vadd.f32 %v1822_v49, %v1821_v62 }
 0x6c3   :  { %v1818_v29 = vadd.f32 %v1817_v21, %v1813_v7  ;;  %v1826_v41 = vadd.f32 %v1825_v57, %v1823_v53 }
 0x6c5   :  { %1819 = vadd.xlane.f32.xlu1 %v1818_v29  ;;  %v1827_v5 = vadd.f32 %v1826_v41, %v1824_v6 }
 0x6c7   :  { %1828 = vadd.xlane.f32.xlu0 %v1827_v5 }
 0x752   :  { %v1820_v0 = vpop.xlane.xlu1 %1819 }
 0x753   :  { %v1830_v28 = vmul.f32 0.001953125, %v1820_v0 }
 0x754   :  { %v1829_v42 = vpop.xlane.xlu0 %1828 }
 0x755   :  { %v1832_v2 = vmul.f32 %v1830_v28, %v1830_v28  ;;  %v1831_v12 = vmul.f32 0.001953125, %v1829_v42 }
 0x757   :  { %v1833_v24 = vsub.f32 %v1831_v12, %v1832_v2 }
 0x759   :  { %v1834_v10 = vadd.f32 1e-05, %v1833_v24 }
 0x75b   :  { %2657 = vrsqrt.f32 %v1834_v10 }
 0x765   :  { %v2658_v51 = vpop.eup %2657 }
 0x766   :  { %v1836_v38 = vmul.f32 %v2658_v51, %v18_v26 }
 0x768   :  { %1845 = vperm.xlu1 %2385, %v1836_v38   ;;  %v1837_v25 = vmul.f32 %v1836_v38, %v1830_v28 }
 0x76a   :  { %1839 = vrot.lane.b32.xlu0 %v1837_v25, %s2707_s18 }
 0x76c   :  { %2386 = vset.pattern.permute.xlu1 %v2706_v39 }
 0x7dc   :  { %v1840_v27 = vpop.permute.xlu0 %1839 }
 0x7dd   :  { %v1842_v43 = vsub.f32 %v18_v26, %v1840_v27 }
 0x7df   :  { %1854 = vperm.xlu1 %2386, %v1842_v43  }
 0x7e3   :  { %2387 = vset.pattern.permute.xlu1 %v2705_v4 }
 0x7e7   :  { %v1846_v56 = vpop.permute.xlu1 %1845 }
 0x7e8   :  { %v1848_v60 = vmul.f32 %v1846_v56, %v1740_v45  ;;  %v1849_v14 = vmul.f32 %v1846_v56, %v1742_v58  ;;  %v1850_v3 = vmul.f32 %v1846_v56, %v1811_v30  ;;  %v1851_v13 = vmul.f32 %v1846_v56, %v1813_v7 }
 0x85e   :  { %v1855_v8 = vpop.permute.xlu1 %1854 }
 0x85f   :  { %v1857_v16 = vadd.f32 %v1855_v8, %v1848_v60  ;;  %v1859_v19 = vadd.f32 %v1855_v8, %v1850_v3  ;;  %v1858_v22 = vadd.f32 %v1855_v8, %v1849_v14  ;;  %v1860_v11 = vadd.f32 %v1855_v8, %v1851_v13 }
 0x861   :  { %v1861_v36 = vmax.f32 %v1857_v16, 0.0  ;;  %v1863_v47 = vmax.f32 %v1859_v19, 0.0  ;;  %v1862_v18 = vmax.f32 %v1858_v22, 0.0  ;;  %v1864_v52 = vmax.f32 %v1860_v11, 0.0 }
 0x863   :  { %1868 = vmatprep.subr.mxu0 %v1862_v18  ;;  %1939 = vmatprep.subr.mxu1 %v1864_v52 }
 0x864   :  { %1869 = vmatpush1.msra.mxu0 %v1861_v36  ;;  %1940 = vmatpush1.msra.mxu1 %v1863_v47 }
 0x865   :  { %2371 = vmatmul.mubr.msk.f32.vlgmr.msra.gmra.mrb[72].mxu0 %vm1670_vm3, %v19_v50  ;;  %2372 = vmatmul.mubr.msk.f32.vlgmr.msra.gmra.mrb[72].mxu1 %vm1670_vm3, %v19_v50 }
 0x938   :  { %v1934_v4 = vpop.f32.mrb[72].mxu0  ;;  %v2005_v39 = vpop.f32.mrb[72].mxu1 }
 0x939   :  { %v2010_v37 = vsel %vm34_vm2, %v1934_v4, 0.0  ;;  %v2019_v54 = vmul.f32 %v1934_v4, %v1934_v4  ;;  %v1936_v59 = vpop.f32.mrb[73].mxu0  ;;  %v2021_v46 = vmul.f32 %v2005_v39, %v2005_v39  ;;  %v2007_v44 = vpop.f32.mrb[73].mxu1  ;;  %v2013_v17 = vsel %vm34_vm2, %v2005_v39, 0.0 }
 0x93a   :  { %v2011_v61 = vsel %vm34_vm2, %v1936_v59, 0.0  ;;  %v2020_v9 = vmul.f32 %v1936_v59, %v1936_v59  ;;  %v2022_v31 = vmul.f32 %v2007_v44, %v2007_v44  ;;  %v2015_v33 = vsel %vm34_vm2, %v2007_v44, 0.0 }
 0x93b   :  { %v2023_v15 = vsel %vm34_vm2, %v2019_v54, 0.0  ;;  %v2012_v40 = vadd.f32 %v2011_v61, %v2010_v37  ;;  %v2026_v32 = vsel %vm34_vm2, %v2021_v46, 0.0 }
 0x93c   :  { %v2024_v20 = vsel %vm34_vm2, %v2020_v9, 0.0  ;;  %v2028_v63 = vsel %vm34_vm2, %v2022_v31, 0.0 }
 0x93d   :  { %v2014_v55 = vadd.f32 %v2013_v17, %v2012_v40  ;;  %v2025_v34 = vadd.f32 %v2024_v20, %v2023_v15 }
 0x93f   :  { %v2016_v35 = vadd.f32 %v2015_v33, %v2014_v55  ;;  %v2027_v48 = vadd.f32 %v2026_v32, %v2025_v34 }
 0x941   :  { %2017 = vadd.xlane.f32.xlu0 %v2016_v35  ;;  %v2029_v26 = vadd.f32 %v2028_v63, %v2027_v48 }
 0x943   :  { %2030 = vadd.xlane.f32.xlu1 %v2029_v26  ;;  %v2067_v26 = vlaneseq }
 0x9ce   :  { %v2018_v45 = vpop.xlane.xlu0 %2017 }
 0x9cf   :  { %v2032_v30 = vmul.f32 0.001953125, %v2018_v45  ;;  %v2677_v45 = vld [vmem:[%s4505_s0 + $0x8] sm:$0xff] }
 0x9d0   :  { %v2031_v62 = vpop.xlane.xlu1 %2030  ;;  %vm21_vm4 = vweird.f32 %v2677_v45 }
 0x9d1   :  { %v2034_v58 = vmul.f32 %v2032_v30, %v2032_v30  ;;  %v2033_v7 = vmul.f32 0.001953125, %v2031_v62  ;;  %v4469_v62 = vand.u32 127, %v2067_v26  ;;  %vm23_vm7 = vmxor %vm21_vm4, %vm2708_vm6 }
 0x9d3   :  { %v2035_v23 = vsub.f32 %v2033_v7, %v2034_v58  ;;  %v2678_v58 = vld [vmem:[%s4505_s0] sm:$0xff]  ;;  %v2328_v7 = vsel %vm23_vm7, 1.0, %v2704_v1  ;;  %s2709_s0 = smov [#allocation2]  }
 0x9d4   :  { %vm20_vm5 = vweird.f32 %v2678_v58  ;;  %s2312_s26 = sshll.u32 %s2709_s0, 4  ;;  %s2313_s26 = int_to_ptr.vmem [resolvable:$true] %s2312_s26 }
 0x9d5   :  { %v2036_v49 = vadd.f32 1e-05, %v2035_v23  ;;  %vm22_vm9 = vmxor %vm20_vm5, %vm2708_vm6  ;;  %s2679_s27 = scalar_lea.vmem %s2313_s26, 256  ;;  %p2684_p1 = scmp.lt.s32.totalorder %s2313_s26, %s2313_s26 }
 0x9d6   :  { %p2680_p0 = scmp.ne.s32.totalorder %s2313_s26, %s2679_s27  ;;  %p2685_p2 = scmp.lt.s32.totalorder %s2679_s27, %s2679_s27 }
 0x9d7   :  { %2659 = vrsqrt.f32 %v2036_v49  ;;  %v2327_v49 = vsel %vm22_vm9, 1.0, %v2704_v1 }
 0x9d8   :  { %p2686_p3 = por %p2685_p2, %p2684_p1 }
 0x9da   :  { %p2687_p4 = pnand %p2686_p3, %p2680_p0 }
 0x9e1   :  { %v2660_v53 = vpop.eup %2659 }
 0x9e2   :  { %v2038_v21 = vmul.f32 %v2660_v53, %v19_v50  ;;  %v31_v53 = vcombine.high %v2328_v7, %v2328_v7 }
 0x9e4   :  { %2047 = vperm.xlu1 %2387, %v2038_v21   ;;  %v2039_v57 = vmul.f32 %v2038_v21, %v2032_v30  ;;  %v2068_v30 = vshrl.u32 %v2067_v26, 7 }
 0x9e6   :  { %2041 = vrot.lane.b32.xlu0 %v2039_v57, %s2707_s18  ;;  %vm2071_vm8 = vcmp.eq.s32.totalorder %v2068_v30, %v4469_v62 }
 0x9e7   :  { %v2373_v23 = vsel %vm2071_vm8, 1.0, %v2704_v1 }
 0xa58   :  { %v2042_v29 = vpop.permute.xlu0 %2041 }
 0xa59   :  { %v2044_v6 = vsub.f32 %v19_v50, %v2042_v29 }
 0xa5b   :  { %2056 = vperm.xlu0 %2388, %v2044_v6   ;;  %v30_v6 = vcombine.high %v2327_v49, %v2327_v49 }
 0xa5d   :  { %v36_v1 = vsel %vm34_vm2, %v30_v6, inf }
 0xa63   :  { %v2048_v41 = vpop.permute.xlu1 %2047 }
 0xa64   :  { %v2050_v5 = vmul.f32 %v2048_v41, %v1934_v4  ;;  %v2051_v0 = vmul.f32 %v2048_v41, %v1936_v59  ;;  %v2052_v28 = vmul.f32 %v2048_v41, %v2005_v39  ;;  %v2053_v42 = vmul.f32 %v2048_v41, %v2007_v44 }
 0xada   :  { %v2057_v2 = vpop.permute.xlu0 %2056 }
 0xadb   :  { %v2061_v12 = vadd.f32 %v2057_v2, %v2052_v28  ;;  %v2062_v24 = vadd.f32 %v2057_v2, %v2053_v42  ;;  %v2059_v10 = vadd.f32 %v2057_v2, %v2050_v5  ;;  %v2060_v51 = vadd.f32 %v2057_v2, %v2051_v0 }
 0xadc   :  { %v40_v42 = vsel %vm34_vm2, %v2328_v7, inf  ;;  %v41_v2 = vsel %vm34_vm2, %v31_v53, inf }
 0xadd   :  { %v2065_v38 = vmax.f32 %v2061_v12, 0.0  ;;  %v2066_v25 = vmax.f32 %v2062_v24, 0.0  ;;  %v2063_v27 = vmax.f32 %v2059_v10, 0.0  ;;  %v2064_v43 = vmax.f32 %v2060_v51, 0.0 }
 0xade   :  { %v35_v10 = vsel %vm34_vm2, %v2327_v49, inf  ;;  %v42_v51 = vmin.f32 %v40_v42, %v41_v2 }
 0xadf   :  { %v2191_v56 = vsel %vm34_vm2, %v2065_v38, -inf  ;;  %v2192_v60 = vsel %vm34_vm2, %v2066_v25, -inf  ;;  %v2074_v14 = vsel %vm34_vm2, %v2063_v27, -inf  ;;  %v2075_v3 = vsel %vm34_vm2, %v2064_v43, -inf }
 0xae0   :  { %v2193_v13 = vmax.f32 %v2191_v56, %v2192_v60  ;;  %v2076_v8 = vmax.f32 %v2074_v14, %v2075_v3 }
 0xae2   :  { %2194 = vmax.xlane.f32.xlu0 %v2193_v13  ;;  %2077 = vmax.xlane.f32.xlu1 %v2076_v8 }
 0xb6f   :  { %v2195_v16 = vpop.xlane.xlu0 %2194  ;;  %v2078_v19 = vpop.xlane.xlu1 %2077 }
 0xb70   :  { %v2196_v22 = vsub.f32 %v2065_v38, %v2195_v16  ;;  %v2197_v11 = vsub.f32 %v2066_v25, %v2195_v16  ;;  %v2079_v36 = vsub.f32 %v2063_v27, %v2078_v19  ;;  %v2080_v47 = vsub.f32 %v2064_v43, %v2078_v19 }
 0xb71   :  { %v37_v25 = vmin.f32 %v35_v10, %v36_v1 }
 0xb72   :  { %v2198_v18 = vmul.f32 1.442695, %v2196_v22  ;;  %v2200_v52 = vmul.f32 1.442695, %v2197_v11  ;;  %v2081_v50 = vmul.f32 1.442695, %v2079_v36 }
 0xb73   :  { %v2083_v4 = vmul.f32 1.442695, %v2080_v47 }
 0xb74   :  { %2661 = vpow2.f32 %v2198_v18 }
 0xb75   :  { %2663 = vpow2.f32 %v2200_v52 }
 0xb76   :  { %2665 = vpow2.f32 %v2081_v50 }
 0xb77   :  { %2667 = vpow2.f32 %v2083_v4 }
 0xb7e   :  { %v2662_v39 = vpop.eup %2661 }
 0xb7f   :  { %v2664_v37 = vpop.eup %2663  ;;  %v2202_v54 = vsel %vm34_vm2, %v2662_v39, 0.0 }
 0xb80   :  { %v2666_v59 = vpop.eup %2665  ;;  %v2203_v46 = vsel %vm34_vm2, %v2664_v37, 0.0 }
 0xb81   :  { %v2668_v44 = vpop.eup %2667  ;;  %v2204_v61 = vadd.f32 %v2203_v46, %v2202_v54  ;;  %v2085_v9 = vsel %vm34_vm2, %v2666_v59, 0.0 }
 0xb82   :  { %v2086_v17 = vsel %vm34_vm2, %v2668_v44, 0.0 }
 0xb83   :  { %2205 = vadd.xlane.f32.xlu1 %v2204_v61  ;;  %v2087_v15 = vadd.f32 %v2086_v17, %v2085_v9 }
 0xb85   :  { %2088 = vadd.xlane.f32.xlu0 %v2087_v15 }
 0xc10   :  { %v2206_v40 = vpop.xlane.xlu1 %2205 }
 0xc11   :  { %2669 = vrcp.f32 %v2206_v40 }
 0xc12   :  { %v2089_v20 = vpop.xlane.xlu0 %2088 }
 0xc13   :  { %2671 = vrcp.f32 %v2089_v20 }
 0xc1b   :  { %v2670_v31 = vpop.eup %2669 }
 0xc1c   :  { %v2209_v32 = vmul.f32 %v2670_v31, %v2664_v37  ;;  %v2208_v55 = vmul.f32 %v2670_v31, %v2662_v39 }
 0xc1d   :  { %v2672_v34 = vpop.eup %2671 }
 0xc1e   :  { %v2092_v33 = vmul.f32 %v2672_v34, %v2668_v44  ;;  %2216 = vmatprep.subr.mxu1 %v2209_v32  ;;  %2280 = vmatprep.mubr.f32.mxu1 %v2209_v32  ;;  %v2091_v35 = vmul.f32 %v2672_v34, %v2666_v59  ;;  %v2212_v48 = vcombine.low %v2208_v55, %v2209_v32 }
 0xc1f   :  { %2217 = vmatpush1.xpose.msra.mxu1 %v2208_v55 }
 0xc20   :  { %2098 = vmatprep.subr.mxu0 %v2092_v33  ;;  %2162 = vmatprep.mubr.f32.mxu0 %v2092_v33  ;;  %v2095_v63 = vcombine.low %v2091_v35, %v2092_v33  ;;  %2215 = vst [vmem:[#allocation2 + $0x8] sm:$0xff] %v2212_v48 }
 0xc21   :  { %2099 = vmatpush1.xpose.msra.mxu0 %v2091_v35 }
 0xc22   :  { %2281 = vmatmul.mubr.f32.vlgmr.msra.gmra.mrb[74].mxu1 %v2208_v55  ;;  %2097 = vst [vmem:[#allocation2] sm:$0xff] %v2095_v63 }
 0xc24   :  { %2163 = vmatmul.mubr.f32.vlgmr.msra.gmra.mrb[74].mxu0 %v2091_v35 }
 0xcf5   :  { %v2282_v21 = vpop.f32.mrb[74].mxu1 }
 0xcf6   :  { %v2286_v57 = vsub.f32 %v2373_v23, %v2282_v21  ;;  %v2284_v29 = vpop.f32.mrb[75].mxu1 }
 0xcf7   :  { %v2164_v41 = vpop.f32.mrb[74].mxu0 }
 0xcf8   :  { %v2168_v5 = vsub.f32 %v2373_v23, %v2164_v41  ;;  %v2287_v0 = vmul.f32 %v2286_v57, %v2286_v57  ;;  %v2166_v28 = vpop.f32.mrb[75].mxu0 }
 0xcfa   :  { %v2169_v12 = vmul.f32 %v2168_v5, %v2168_v5  ;;  %v2288_v24 = vsel %vm2170_vm10, %v2287_v0, 0.0 }
 0xcfb   :  { %2289 = vadd.xlane.f32.xlu1 %v2288_v24 }
 0xcfc   :  { %v2171_v38 = vsel %vm2170_vm10, %v2169_v12, 0.0 }
 0xcfd   :  { %2172 = vadd.xlane.f32.xlu0 %v2171_v38 }
 0xcff   :  { %43 = vmin.xlane.f32.xlu1 %v42_v51 }
 0xd01   :  { %38 = vmin.xlane.f32.xlu0 %v37_v25 }
 0xd02   :  { %2690 = shalt.err (!%p2687_p4)
}
 0xd03   :  { %s2691_s30 = scalar_lea.hbm %s4507_s2, 256 }
 0xd04   :  { %p2692_p5 = scmp.ne.s32.totalorder %s4507_s2, %s2691_s30  ;;  %p2695_p6 = scmp.lt.u32.totalorder %s2691_s30, %s4507_s2 }
 0xd06   :  { %p2697_p7 = pnand %p2695_p6, %p2692_p5 }
 0xd08   :  { %2700 = shalt.err (!%p2697_p7)
}
 0xd09   :  { %s2710_s8 = smov 128   ;;  %s2711_s9 = smov 8   ;;  %vm2188_vm11 = vcmp.eq.s32.totalorder %v4469_v62, 1 }
 0xd0a   :  { %2318 = dma.vmem_to_hbm [thread:$0]  %s2313_s26, 256, %s4507_s2, [#allocation3], %s2710_s8, %s2710_s8, %s2711_s9  }
 0xd88   :  { %v2290_v27 = vpop.xlane.xlu1 %2289 }
 0xd89   :  { %v2291_v43 = vsel %vm34_vm2, %v2290_v27, 0.0 }
 0xd8a   :  { %v2173_v56 = vpop.xlane.xlu0 %2172  ;;  %v2292_v60 = vrot.slane %v2291_v43, 4 }
 0xd8b   :  { %v2174_v14 = vsel %vm34_vm2, %v2173_v56, 0.0 }
 0xd8c   :  { %v2175_v3 = vrot.slane %v2174_v14, 4  ;;  %v2293_v13 = vadd.f32 %v2292_v60, %v2291_v43  ;;  %v44_v8 = vpop.xlane.xlu1 %43 }
 0xd8d   :  { %v52_v16 = vsel %vm34_vm2, %v44_v8, inf }
 0xd8e   :  { %v2176_v19 = vadd.f32 %v2175_v3, %v2174_v14  ;;  %v2294_v22 = vrot.slane %v2293_v13, 2  ;;  %v53_v11 = vrot.slane %v52_v16, 4  ;;  %v39_v36 = vpop.xlane.xlu0 %38 }
 0xd8f   :  { %v45_v47 = vsel %vm34_vm2, %v39_v36, inf }
 0xd90   :  { %v2177_v18 = vrot.slane %v2176_v19, 2  ;;  %v2295_v52 = vadd.f32 %v2294_v22, %v2293_v13  ;;  %v54_v50 = vmin.f32 %v52_v16, %v53_v11  ;;  %v46_v4 = vrot.slane %v45_v47, 4 }
 0xd92   :  { %v2178_v39 = vadd.f32 %v2177_v18, %v2176_v19  ;;  %v2296_v37 = vrot.slane %v2295_v52, 1  ;;  %v47_v54 = vmin.f32 %v45_v47, %v46_v4  ;;  %v55_v59 = vrot.slane %v54_v50, 2 }
 0xd94   :  { %v2179_v46 = vrot.slane %v2178_v39, 1  ;;  %v2297_v44 = vadd.f32 %v2296_v37, %v2295_v52  ;;  %v48_v61 = vrot.slane %v47_v54, 2  ;;  %v56_v17 = vmin.f32 %v54_v50, %v55_v59 }
 0xd96   :  { %v2180_v9 = vadd.f32 %v2179_v46, %v2178_v39  ;;  %2673 = vrsqrt.f32 %v2297_v44  ;;  %v49_v15 = vmin.f32 %v47_v54, %v48_v61  ;;  %v57_v40 = vrot.slane %v56_v17, 1 }
 0xd97   :  { %vm2300_vm12 = vcmp.eq.f32.partialorder %v2297_v44, inf  ;;  %v2303_v35 = vand.u32 2147483648, %v2297_v44  ;;  %vm2302_vm13 = vcmp.eq.f32.partialorder %v2297_v44, 0.0 }
 0xd98   :  { %2675 = vrsqrt.f32 %v2180_v9  ;;  %v50_v20 = vrot.slane %v49_v15, 1  ;;  %v58_v31 = vmin.f32 %v56_v17, %v57_v40  ;;  %vm2183_vm14 = vcmp.eq.f32.partialorder %v2180_v9, inf }
 0xd99   :  { %v2186_v45 = vand.u32 2147483648, %v2180_v9  ;;  %vm2185_vm15 = vcmp.eq.f32.partialorder %v2180_v9, 0.0 }
 0xd9a   :  { %v51_v32 = vmin.f32 %v49_v15, %v50_v20 }
 0xd9c   :  { %v59_v26 = vmin.f32 %v51_v32, %v58_v31 }
 0xda0   :  { %v2674_v55 = vpop.eup %2673 }
 0xda1   :  { %v2299_v34 = vmul.f32 %v2674_v55, %v2297_v44 }
 0xda2   :  { %v2676_v33 = vpop.eup %2675 }
 0xda3   :  { %v2182_v48 = vmul.f32 %v2676_v33, %v2180_v9  ;;  %v2301_v63 = vsel %vm2300_vm12, %v2297_v44, %v2299_v34 }
 0xda4   :  { %v2304_v30 = vsel %vm2302_vm13, %v2303_v35, %v2301_v63 }
 0xda5   :  { %v2184_v58 = vsel %vm2183_vm14, %v2180_v9, %v2182_v48  ;;  %v2305_v7 = vsel %vm2188_vm11, %v59_v26, %v2304_v30 }
 0xda6   :  { %v2187_v23 = vsel %vm2185_vm15, %v2186_v45, %v2184_v58  ;;  %2306 = vst [vmem:[%s4508_s3 + $0x1] sm:$0x1] %v2305_v7 }
 0xda7   :  { %v2189_v49 = vsel %vm2188_vm11, %v59_v26, %v2187_v23 }
 0xda8   :  { %2190 = vst [vmem:[%s4508_s3] sm:$0x1] %v2189_v49 }
 0xda9   :  { %2701 = dma.done.wait [#allocation3], 256  }
 0xdaa   :  { %2702 = vsyncadd [#allocation3], 4294967040 }
 0xdab   :  { %2326 = vsyncpa [#allocation3], 1 }

</bundles_post_ra>
